<compile_context>
chip_gen: v7x
topology: tpu7x:2x2x1
jax: 0.10.0
libtpu: 0.0.40
codegen_flags: <defaults>
</compile_context>

<pallas_src>
import jax
import jax.numpy as jnp
from jax.experimental import pallas as pl
from jax.experimental.pallas import tpu as pltpu

# ----------------------------- model dimensions -----------------------------
B = 2            # batch
NUM_CHOICES = 4  # task.NUM_CHOICES
S = 8            # sequence length
H = 32           # hidden size
F = 64           # FFN intermediate size
V = 100          # vocab size
NUM_SEG = 2      # segment vocab

# packed embedding slab: rows [0:V) token, [SEG_OFF:SEG_OFF+NUM_SEG) segment,
# [POS_OFF:POS_OFF+S) position
SEG_OFF = V
POS_OFF = V + NUM_SEG
EMB_ROWS = V + NUM_SEG + S

# packed bias/LN slab row indices
B_QKV, B_O, B_1, B_2 = 0, 1, 2, 3
B_LN1G, B_LN1B, B_LN2G, B_LN2B = 4, 5, 6, 7
B_P, B_D, B_OUT, B_WOUT_T = 8, 9, 10, 11
NUM_B_ROWS = 12
B_WIDTH = 128


# ------------------------------- Pallas kernel -------------------------------
def encoder_head_kernel(idx_ref, mask_ref, emb_ref, w_ref, w2_ref, b_ref, out_ref):
    ns = idx_ref.shape[0]              # N * S flattened token rows
    n, s = mask_ref.shape              # sequences, sequence length
    h = emb_ref.shape[1]               # hidden size
    f = w2_ref.shape[0]                # FFN intermediate size

    # ---- embeddings: fused (token + segment + position) one-hot matmul ----
    idx = idx_ref[...]                                                      # (NS, 3)
    lane = jax.lax.broadcasted_iota(jnp.int32, (ns, emb_ref.shape[0]), 1)
    onehot = ((lane == idx[:, 0:1]) | (lane == idx[:, 1:2]) |
              (lane == idx[:, 2:3])).astype(jnp.float32)                    # (NS, EMB_ROWS)
    x = jnp.dot(onehot, emb_ref[...], preferred_element_type=jnp.float32)   # (NS, H)

    w = w_ref[...]                                                          # (H, 6H+F)
    b = b_ref[...]                                                          # (12, 128)

    # packed weight-slab column offsets: [wqkv | wo | w1 | wp | wd]
    o_qkv, o_wo, o_w1, o_wp, o_wd = 0, 3 * h, 4 * h, 4 * h + f, 5 * h + f

    # ---- fused QKV projection ----
    qkv = jnp.dot(x, w[:, o_qkv:o_qkv + 3 * h],
                  preferred_element_type=jnp.float32) + b[B_QKV:B_QKV + 1, 0:3 * h]
    q = qkv[:, 0:h].reshape(n, s, h)
    k = qkv[:, h:2 * h].reshape(n, s, h)
    v = qkv[:, 2 * h:3 * h].reshape(n, s, h)

    # ---- batched self-attention over all N sequences (no explicit k.T) ----
    scale = 1.0 / (h ** 0.5)
    att = jnp.einsum("nqd,nkd->nqk", q, k,
                     preferred_element_type=jnp.float32) * scale            # (N, S, S)
    att = att + (mask_ref[...][:, None, :] - 1.0) * 1e9                     # mask padded keys
    att = att - jnp.max(att, axis=-1, keepdims=True)
    p = jnp.exp(att)
    p = p * pl.reciprocal(jnp.sum(p, axis=-1, keepdims=True), approx=True)
    ctx = jnp.einsum("nqk,nkd->nqd", p, v,
                     preferred_element_type=jnp.float32).reshape(ns, h)     # (NS, H)
    ctx = jnp.dot(ctx, w[:, o_wo:o_wo + h],
                  preferred_element_type=jnp.float32) + b[B_O:B_O + 1, 0:h]

    # ---- add & norm 1 (single-pass statistics) ----
    h1 = x + ctx
    mu = jnp.mean(h1, axis=-1, keepdims=True)
    var = jnp.mean(h1 * h1, axis=-1, keepdims=True) - mu * mu
    h1 = ((h1 - mu) * jax.lax.rsqrt(var + 1e-12) * b[B_LN1G:B_LN1G + 1, 0:h]
          + b[B_LN1B:B_LN1B + 1, 0:h])

    # ---- FFN ----
    ff = jnp.dot(h1, w[:, o_w1:o_w1 + f],
                 preferred_element_type=jnp.float32) + b[B_1:B_1 + 1, 0:f]
    ff = jax.nn.gelu(ff)
    ff = jnp.dot(ff, w2_ref[...],
                 preferred_element_type=jnp.float32) + b[B_2:B_2 + 1, 0:h]

    # ---- add & norm 2 (single-pass statistics) ----
    h2 = h1 + ff
    mu2 = jnp.mean(h2, axis=-1, keepdims=True)
    var2 = jnp.mean(h2 * h2, axis=-1, keepdims=True) - mu2 * mu2
    h2 = ((h2 - mu2) * jax.lax.rsqrt(var2 + 1e-12) * b[B_LN2G:B_LN2G + 1, 0:h]
          + b[B_LN2B:B_LN2B + 1, 0:h])

    # ---- pooler + RegressionHead for every token row (wrapper picks the CLS rows;
    #      identical values, avoids an in-kernel strided row gather, keeps output lane-dense)
    pooled = jnp.tanh(jnp.dot(h2, w[:, o_wp:o_wp + h],
                              preferred_element_type=jnp.float32) + b[B_P:B_P + 1, 0:h])
    d = jnp.tanh(jnp.dot(pooled, w[:, o_wd:o_wd + h],
                         preferred_element_type=jnp.float32) + b[B_D:B_D + 1, 0:h])
    # lane-dense (1, NS) score: wout^T stored as a slab row, contract both operands on H
    score = jax.lax.dot_general(b[B_WOUT_T:B_WOUT_T + 1, 0:h], d,
                                dimension_numbers=(((1,), (1,)), ((), ())),
                                preferred_element_type=jnp.float32)         # (1, NS)
    out_ref[...] = score + b[B_OUT:B_OUT + 1, 0:1]


# ----------------------------- parameter packing ------------------------------
def pack_params(p):
    h = p["wq"].shape[0]

    emb = jnp.zeros((EMB_ROWS, h), jnp.float32)
    emb = emb.at[0:V].set(p["tok_emb"])
    emb = emb.at[SEG_OFF:SEG_OFF + NUM_SEG].set(p["seg_emb"])
    emb = emb.at[POS_OFF:POS_OFF + S].set(p["pos_emb"])

    # (H, 6H + F): [wq|wk|wv | wo | w1 | wp | wd]
    w_slab = jnp.concatenate(
        [p["wq"], p["wk"], p["wv"], p["wo"], p["w1"], p["wp"], p["wd"]], axis=1)

    rows = [None] * NUM_B_ROWS
    rows[B_QKV] = jnp.concatenate([p["bq"], p["bk"], p["bv"]], axis=1)
    rows[B_O] = p["bo"]
    rows[B_1] = p["b1"]
    rows[B_2] = p["b2"]
    rows[B_LN1G] = p["ln1_g"]
    rows[B_LN1B] = p["ln1_b"]
    rows[B_LN2G] = p["ln2_g"]
    rows[B_LN2B] = p["ln2_b"]
    rows[B_P] = p["bp"]
    rows[B_D] = p["bd"]
    rows[B_OUT] = p["bout"]
    rows[B_WOUT_T] = p["wout"].T          # out_proj weight, transposed to (1, H)

    b_slab = jnp.zeros((NUM_B_ROWS, B_WIDTH), jnp.float32)
    for r, arr in enumerate(rows):
        b_slab = b_slab.at[r, 0:arr.shape[1]].set(arr[0])

    return {"emb": emb, "w_slab": w_slab, "w2": p["w2"], "b_slab": b_slab}


# ------------------------------ wrapper (glue) -------------------------------
@jax.jit
def multiple_choice_forward(packed, input_ids, segment_ids, input_mask):
    """input_ids / segment_ids / input_mask: (B, C, S) int32.  Returns logits (B, C)."""
    b, c, s = input_ids.shape
    n = b * c
    ns = n * s

    tok = input_ids.reshape(ns, 1).astype(jnp.int32)
    seg = segment_ids.reshape(ns, 1).astype(jnp.int32) + SEG_OFF
    pos = jnp.tile(jnp.arange(s, dtype=jnp.int32), n).reshape(ns, 1) + POS_OFF
    idx_all = jnp.concatenate([tok, seg, pos], axis=1)                   # (NS, 3)
    mask = input_mask.reshape(n, s).astype(jnp.float32)                  # (N, S)

    operands = (idx_all, mask, packed["emb"], packed["w_slab"],
                packed["w2"], packed["b_slab"])

    def _full_spec(arr):
        nd = arr.ndim
        return pl.BlockSpec(arr.shape, lambda i, _nd=nd: (0,) * _nd)

    scores = pl.pallas_call(
        encoder_head_kernel,
        out_shape=jax.ShapeDtypeStruct((1, ns), jnp.float32),
        grid=(1,),                                    # single step: whole batch at once
        in_specs=[_full_spec(op) for op in operands],
        out_specs=pl.BlockSpec((1, ns), lambda i: (0, 0)),
        compiler_params=pltpu.CompilerParams(dimension_semantics=("arbitrary",)),
    )(*operands)

    # row 0 of each sequence is the [CLS] score; matches
    # torch.cat([score.unsqueeze(1).squeeze(-1) for score in ...], dim=1) -> (B, C)
    logits = scores[0].reshape(n, s)[:, 0].reshape(b, c)
    return logits
    # TODO(synk): compute_loss=True (CrossEntropyLoss over logits) and the (empty)
    # encoder_output.other reshaping are not implemented in the kernel path.


# ------------------------------ pure-JAX reference ---------------------------
def reference_forward(params, input_ids, segment_ids, input_mask):
    b, c, s = input_ids.shape
    n = b * c
    ids = input_ids.reshape(n, s)
    segs = segment_ids.reshape(n, s)
    msk = input_mask.reshape(n, s).astype(jnp.float32)
    x = params["tok_emb"][ids] + params["seg_emb"][segs] + params["pos_emb"][None]

    def one(xs, ms):
        q = xs @ params["wq"] + params["bq"]
        k = xs @ params["wk"] + params["bk"]
        v = xs @ params["wv"] + params["bv"]
        att = (q @ k.T) / jnp.sqrt(jnp.float32(xs.shape[-1]))
        att = att + (ms[None, :] - 1.0) * 1e9
        p = jax.nn.softmax(att, axis=-1)
        ctx = (p @ v) @ params["wo"] + params["bo"]
        h1 = xs + ctx
        mu = jnp.mean(h1, -1, keepdims=True)
        var = jnp.mean((h1 - mu) ** 2, -1, keepdims=True)
        h1 = (h1 - mu) * jax.lax.rsqrt(var + 1e-12) * params["ln1_g"] + params["ln1_b"]
        ff = jax.nn.gelu(h1 @ params["w1"] + params["b1"]) @ params["w2"] + params["b2"]
        h2 = h1 + ff
        mu2 = jnp.mean(h2, -1, keepdims=True)
        var2 = jnp.mean((h2 - mu2) ** 2, -1, keepdims=True)
        h2 = (h2 - mu2) * jax.lax.rsqrt(var2 + 1e-12) * params["ln2_g"] + params["ln2_b"]
        pooled = jnp.tanh(h2[0:1] @ params["wp"] + params["bp"])
        d = jnp.tanh(pooled @ params["wd"] + params["bd"])
        return (d @ params["wout"] + params["bout"])[0]

    scores = jax.vmap(one)(x, msk)          # (N, 1)
    return scores.reshape(b, c)


# -------------------------------- param init ---------------------------------
def init_params(key):
    shapes = {
        "tok_emb": (V, H), "seg_emb": (NUM_SEG, H), "pos_emb": (S, H),
        "wq": (H, H), "bq": (1, H), "wk": (H, H), "bk": (1, H),
        "wv": (H, H), "bv": (1, H), "wo": (H, H), "bo": (1, H),
        "ln1_g": (1, H), "ln1_b": (1, H),
        "w1": (H, F), "b1": (1, F), "w2": (F, H), "b2": (1, H),
        "ln2_g": (1, H), "ln2_b": (1, H),
        "wp": (H, H), "bp": (1, H),
        "wd": (H, H), "bd": (1, H), "wout": (H, 1), "bout": (1, 1),
    }
    params = {}
    keys = jax.random.split(key, len(shapes))
    for k, (name, shp) in zip(keys, sorted(shapes.items())):
        if name.startswith("b") or name.endswith("_b"):
            params[name] = jnp.zeros(shp, jnp.float32)
        elif name.endswith("_g"):
            params[name] = jnp.ones(shp, jnp.float32)
        else:
            params[name] = 0.02 * jax.random.normal(k, shp, jnp.float32)
    return params


# ----------------------------------- main ------------------------------------
if __name__ == "__main__":
    root = jax.random.PRNGKey(0)
    kp, k_ids, k_seg, k_len = jax.random.split(root, 4)

    params = init_params(kp)
    packed = pack_params(params)

    input_ids = jax.random.randint(k_ids, (B, NUM_CHOICES, S), 0, V, dtype=jnp.int32)
    segment_ids = jax.random.randint(k_seg, (B, NUM_CHOICES, S), 0, NUM_SEG, dtype=jnp.int32)
    lengths = jax.random.randint(k_len, (B, NUM_CHOICES), 3, S + 1, dtype=jnp.int32)
    input_mask = (jnp.arange(S)[None, None, :] < lengths[..., None]).astype(jnp.int32)

    logits = multiple_choice_forward(packed, input_ids, segment_ids, input_mask)
    logits = jax.block_until_ready(logits)

    ref = reference_forward(params, input_ids, segment_ids, input_mask)
    assert logits.shape == (B, NUM_CHOICES), logits.shape
    assert jnp.allclose(logits, ref, atol=1e-3, rtol=1e-3), (logits, ref)

    print("KERNEL_OK")
</pallas_src>

<mosaic_0001>
module attributes {stable_mosaic.version = 11 : i64} {
  func.func @encoder_head_kernel(%arg0: i32, %arg1: memref<64x3xi32, #tpu.memory_space<vmem>>, %arg2: memref<8x8xf32, #tpu.memory_space<vmem>>, %arg3: memref<110x32xf32, #tpu.memory_space<vmem>>, %arg4: memref<32x256xf32, #tpu.memory_space<vmem>>, %arg5: memref<64x32xf32, #tpu.memory_space<vmem>>, %arg6: memref<12x128xf32, #tpu.memory_space<vmem>>, %arg7: memref<1x64xf32, #tpu.memory_space<vmem>>) attributes {dimension_semantics = [#tpu.dimension_semantics<arbitrary>], iteration_bounds = array<i64: 1>, scalar_prefetch = 0 : i64, scratch_operands = 0 : i64, tpu.core_type = #tpu.core_type<tc>, window_params = [{pipeline_mode = #tpu.pipeline_mode<synchronous>, transform_indices = @transform_0, window_bounds = array<i64: 64, 3>}, {pipeline_mode = #tpu.pipeline_mode<synchronous>, transform_indices = @transform_1, window_bounds = array<i64: 8, 8>}, {pipeline_mode = #tpu.pipeline_mode<synchronous>, transform_indices = @transform_2, window_bounds = array<i64: 110, 32>}, {pipeline_mode = #tpu.pipeline_mode<synchronous>, transform_indices = @transform_3, window_bounds = array<i64: 32, 256>}, {pipeline_mode = #tpu.pipeline_mode<synchronous>, transform_indices = @transform_4, window_bounds = array<i64: 64, 32>}, {pipeline_mode = #tpu.pipeline_mode<synchronous>, transform_indices = @transform_5, window_bounds = array<i64: 12, 128>}, {pipeline_mode = #tpu.pipeline_mode<synchronous>, transform_indices = @transform_6, window_bounds = array<i64: 1, 64>}]} {
    %c0 = arith.constant 0 : index
    %c0_0 = arith.constant 0 : index
    %0 = vector.load %arg1[%c0, %c0_0] : memref<64x3xi32, #tpu.memory_space<vmem>>, vector<64x3xi32>
    %1 = tpu.iota {dimensions = array<i32: 1>} : vector<64x110xi32>
    %2 = vector.extract_strided_slice %0 {offsets = [0, 0], sizes = [64, 1], strides = [1, 1]} : vector<64x3xi32> to vector<64x1xi32>
    %3 = vector.broadcast %2 : vector<64x1xi32> to vector<64x110xi32>
    %4 = arith.cmpi eq, %1, %3 : vector<64x110xi32>
    %5 = vector.extract_strided_slice %0 {offsets = [0, 1], sizes = [64, 1], strides = [1, 1]} : vector<64x3xi32> to vector<64x1xi32>
    %6 = vector.broadcast %5 : vector<64x1xi32> to vector<64x110xi32>
    %7 = arith.cmpi eq, %1, %6 : vector<64x110xi32>
    %8 = arith.ori %4, %7 : vector<64x110xi1>
    %9 = vector.extract_strided_slice %0 {offsets = [0, 2], sizes = [64, 1], strides = [1, 1]} : vector<64x3xi32> to vector<64x1xi32>
    %10 = vector.broadcast %9 : vector<64x1xi32> to vector<64x110xi32>
    %11 = arith.cmpi eq, %1, %10 : vector<64x110xi32>
    %12 = arith.ori %8, %11 : vector<64x110xi1>
    %13 = arith.extui %12 : vector<64x110xi1> to vector<64x110xi32>
    %14 = arith.sitofp %13 : vector<64x110xi32> to vector<64x110xf32>
    %c0_1 = arith.constant 0 : index
    %c0_2 = arith.constant 0 : index
    %15 = vector.load %arg3[%c0_1, %c0_2] : memref<110x32xf32, #tpu.memory_space<vmem>>, vector<110x32xf32>
    %cst = arith.constant dense<0.000000e+00> : vector<64x32xf32>
    %16 = tpu.matmul %14, %15, %cst {dimension_numbers = #tpu.dot_dimension_numbers<[1], [0], [0], [1], [0, 0, 1, 1], [], []>} : vector<64x110xf32>, vector<110x32xf32>, vector<64x32xf32> -> vector<64x32xf32>
    %c0_3 = arith.constant 0 : index
    %c0_4 = arith.constant 0 : index
    %17 = vector.load %arg4[%c0_3, %c0_4] : memref<32x256xf32, #tpu.memory_space<vmem>>, vector<32x256xf32>
    %c0_5 = arith.constant 0 : index
    %c0_6 = arith.constant 0 : index
    %18 = vector.load %arg6[%c0_5, %c0_6] : memref<12x128xf32, #tpu.memory_space<vmem>>, vector<12x128xf32>
    %19 = vector.extract_strided_slice %17 {offsets = [0, 0], sizes = [32, 96], strides = [1, 1]} : vector<32x256xf32> to vector<32x96xf32>
    %cst_7 = arith.constant dense<0.000000e+00> : vector<64x96xf32>
    %20 = tpu.matmul %16, %19, %cst_7 {dimension_numbers = #tpu.dot_dimension_numbers<[1], [0], [0], [1], [0, 0, 1, 1], [], []>} : vector<64x32xf32>, vector<32x96xf32>, vector<64x96xf32> -> vector<64x96xf32>
    %21 = vector.extract_strided_slice %18 {offsets = [0, 0], sizes = [1, 96], strides = [1, 1]} : vector<12x128xf32> to vector<1x96xf32>
    %22 = vector.broadcast %21 : vector<1x96xf32> to vector<64x96xf32>
    %23 = arith.addf %20, %22 : vector<64x96xf32>
    %24 = vector.extract_strided_slice %23 {offsets = [0, 0], sizes = [64, 32], strides = [1, 1]} : vector<64x96xf32> to vector<64x32xf32>
    %25 = vector.shape_cast %24 : vector<64x32xf32> to vector<8x8x32xf32>
    %26 = vector.extract_strided_slice %23 {offsets = [0, 32], sizes = [64, 32], strides = [1, 1]} : vector<64x96xf32> to vector<64x32xf32>
    %27 = vector.shape_cast %26 : vector<64x32xf32> to vector<8x8x32xf32>
    %28 = vector.extract_strided_slice %23 {offsets = [0, 64], sizes = [64, 32], strides = [1, 1]} : vector<64x96xf32> to vector<64x32xf32>
    %29 = vector.shape_cast %28 : vector<64x32xf32> to vector<8x8x32xf32>
    "tpu.trace_start"() <{level = 10 : i32, message = "nqd,nkd->nqk"}> : () -> ()
    %cst_8 = arith.constant dense<0.000000e+00> : vector<8x8x8xf32>
    %30 = tpu.matmul %25, %27, %cst_8 {dimension_numbers = #tpu.dot_dimension_numbers<[2], [2], [1], [1], [0, 0, 0, 1, 1, 1], [0], [0]>} : vector<8x8x32xf32>, vector<8x8x32xf32>, vector<8x8x8xf32> -> vector<8x8x8xf32>
    "tpu.trace_stop"() : () -> ()
    %cst_9 = arith.constant 0.176776692 : f32
    %31 = vector.broadcast %cst_9 : f32 to vector<8x8x8xf32>
    %32 = arith.mulf %30, %31 : vector<8x8x8xf32>
    %c0_10 = arith.constant 0 : index
    %c0_11 = arith.constant 0 : index
    %33 = vector.load %arg2[%c0_10, %c0_11] : memref<8x8xf32, #tpu.memory_space<vmem>>, vector<8x8xf32>
    %34 = vector.shape_cast %33 : vector<8x8xf32> to vector<8x1x8xf32>
    %cst_12 = arith.constant 1.000000e+00 : f32
    %35 = vector.broadcast %cst_12 : f32 to vector<8x1x8xf32>
    %36 = arith.subf %34, %35 : vector<8x1x8xf32>
    %cst_13 = arith.constant 1.000000e+09 : f32
    %37 = vector.broadcast %cst_13 : f32 to vector<8x1x8xf32>
    %38 = arith.mulf %36, %37 : vector<8x1x8xf32>
    %39 = vector.broadcast %38 : vector<8x1x8xf32> to vector<8x8x8xf32>
    %40 = arith.addf %32, %39 : vector<8x8x8xf32>
    %cst_14 = arith.constant dense<0xFF800000> : vector<8x8xf32>
    %41 = vector.multi_reduction <maximumf>, %40, %cst_14 [2] : vector<8x8x8xf32> to vector<8x8xf32>
    %42 = vector.shape_cast %41 : vector<8x8xf32> to vector<8x8x1xf32>
    %43 = vector.broadcast %42 : vector<8x8x1xf32> to vector<8x8x8xf32>
    %44 = arith.subf %40, %43 : vector<8x8x8xf32>
    %45 = math.exp %44 : vector<8x8x8xf32>
    %cst_15 = arith.constant dense<0.000000e+00> : vector<8x8xf32>
    %46 = vector.multi_reduction <add>, %45, %cst_15 [2] : vector<8x8x8xf32> to vector<8x8xf32>
    %47 = vector.shape_cast %46 : vector<8x8xf32> to vector<8x8x1xf32>
    %48 = tpu.reciprocal %47 {approx = true} : vector<8x8x1xf32> -> vector<8x8x1xf32>
    %49 = vector.broadcast %48 : vector<8x8x1xf32> to vector<8x8x8xf32>
    %50 = arith.mulf %45, %49 : vector<8x8x8xf32>
    "tpu.trace_start"() <{level = 10 : i32, message = "nqk,nkd->nqd"}> : () -> ()
    %cst_16 = arith.constant dense<0.000000e+00> : vector<8x8x32xf32>
    %51 = tpu.matmul %50, %29, %cst_16 {dimension_numbers = #tpu.dot_dimension_numbers<[2], [1], [1], [2], [0, 0, 0, 1, 1, 2], [0], [0]>} : vector<8x8x8xf32>, vector<8x8x32xf32>, vector<8x8x32xf32> -> vector<8x8x32xf32>
    "tpu.trace_stop"() : () -> ()
    %52 = vector.shape_cast %51 : vector<8x8x32xf32> to vector<64x32xf32>
    %53 = vector.extract_strided_slice %17 {offsets = [0, 96], sizes = [32, 32], strides = [1, 1]} : vector<32x256xf32> to vector<32x32xf32>
    %cst_17 = arith.constant dense<0.000000e+00> : vector<64x32xf32>
    %54 = tpu.matmul %52, %53, %cst_17 {dimension_numbers = #tpu.dot_dimension_numbers<[1], [0], [0], [1], [0, 0, 1, 1], [], []>} : vector<64x32xf32>, vector<32x32xf32>, vector<64x32xf32> -> vector<64x32xf32>
    %55 = vector.extract_strided_slice %18 {offsets = [1, 0], sizes = [1, 32], strides = [1, 1]} : vector<12x128xf32> to vector<1x32xf32>
    %56 = vector.broadcast %55 : vector<1x32xf32> to vector<64x32xf32>
    %57 = arith.addf %54, %56 : vector<64x32xf32>
    %58 = arith.addf %16, %57 : vector<64x32xf32>
    %cst_18 = arith.constant dense<0.000000e+00> : vector<64xf32>
    %59 = vector.multi_reduction <add>, %58, %cst_18 [1] : vector<64x32xf32> to vector<64xf32>
    %60 = vector.shape_cast %59 : vector<64xf32> to vector<64x1xf32>
    %cst_19 = arith.constant 3.200000e+01 : f32
    %61 = vector.broadcast %cst_19 : f32 to vector<64x1xf32>
    %62 = arith.divf %60, %61 : vector<64x1xf32>
    %63 = arith.mulf %58, %58 : vector<64x32xf32>
    %cst_20 = arith.constant dense<0.000000e+00> : vector<64xf32>
    %64 = vector.multi_reduction <add>, %63, %cst_20 [1] : vector<64x32xf32> to vector<64xf32>
    %65 = vector.shape_cast %64 : vector<64xf32> to vector<64x1xf32>
    %cst_21 = arith.constant 3.200000e+01 : f32
    %66 = vector.broadcast %cst_21 : f32 to vector<64x1xf32>
    %67 = arith.divf %65, %66 : vector<64x1xf32>
    %68 = arith.mulf %62, %62 : vector<64x1xf32>
    %69 = arith.subf %67, %68 : vector<64x1xf32>
    %70 = vector.broadcast %62 : vector<64x1xf32> to vector<64x32xf32>
    %71 = arith.subf %58, %70 : vector<64x32xf32>
    %cst_22 = arith.constant 9.99999996E-13 : f32
    %72 = vector.broadcast %cst_22 : f32 to vector<64x1xf32>
    %73 = arith.addf %69, %72 : vector<64x1xf32>
    %74 = math.rsqrt %73 : vector<64x1xf32>
    %75 = vector.broadcast %74 : vector<64x1xf32> to vector<64x32xf32>
    %76 = arith.mulf %71, %75 : vector<64x32xf32>
    %77 = vector.extract_strided_slice %18 {offsets = [4, 0], sizes = [1, 32], strides = [1, 1]} : vector<12x128xf32> to vector<1x32xf32>
    %78 = vector.broadcast %77 : vector<1x32xf32> to vector<64x32xf32>
    %79 = arith.mulf %76, %78 : vector<64x32xf32>
    %80 = vector.extract_strided_slice %18 {offsets = [5, 0], sizes = [1, 32], strides = [1, 1]} : vector<12x128xf32> to vector<1x32xf32>
    %81 = vector.broadcast %80 : vector<1x32xf32> to vector<64x32xf32>
    %82 = arith.addf %79, %81 : vector<64x32xf32>
    %83 = vector.extract_strided_slice %17 {offsets = [0, 128], sizes = [32, 64], strides = [1, 1]} : vector<32x256xf32> to vector<32x64xf32>
    %cst_23 = arith.constant dense<0.000000e+00> : vector<64x64xf32>
    %84 = tpu.matmul %82, %83, %cst_23 {dimension_numbers = #tpu.dot_dimension_numbers<[1], [0], [0], [1], [0, 0, 1, 1], [], []>} : vector<64x32xf32>, vector<32x64xf32>, vector<64x64xf32> -> vector<64x64xf32>
    %85 = vector.extract_strided_slice %18 {offsets = [2, 0], sizes = [1, 64], strides = [1, 1]} : vector<12x128xf32> to vector<1x64xf32>
    %86 = vector.broadcast %85 : vector<1x64xf32> to vector<64x64xf32>
    %87 = arith.addf %84, %86 : vector<64x64xf32>
    %88 = arith.mulf %87, %87 : vector<64x64xf32>
    %89 = arith.mulf %87, %88 : vector<64x64xf32>
    %cst_24 = arith.constant 4.471500e-02 : f32
    %90 = vector.broadcast %cst_24 : f32 to vector<64x64xf32>
    %91 = arith.mulf %90, %89 : vector<64x64xf32>
    %92 = arith.addf %87, %91 : vector<64x64xf32>
    %cst_25 = arith.constant 0.797884583 : f32
    %93 = vector.broadcast %cst_25 : f32 to vector<64x64xf32>
    %94 = arith.mulf %93, %92 : vector<64x64xf32>
    %95 = math.tanh %94 : vector<64x64xf32>
    %cst_26 = arith.constant 1.000000e+00 : f32
    %96 = vector.broadcast %cst_26 : f32 to vector<64x64xf32>
    %97 = arith.addf %96, %95 : vector<64x64xf32>
    %cst_27 = arith.constant 5.000000e-01 : f32
    %98 = vector.broadcast %cst_27 : f32 to vector<64x64xf32>
    %99 = arith.mulf %98, %97 : vector<64x64xf32>
    %100 = arith.mulf %87, %99 : vector<64x64xf32>
    %c0_28 = arith.constant 0 : index
    %c0_29 = arith.constant 0 : index
    %101 = vector.load %arg5[%c0_28, %c0_29] : memref<64x32xf32, #tpu.memory_space<vmem>>, vector<64x32xf32>
    %cst_30 = arith.constant dense<0.000000e+00> : vector<64x32xf32>
    %102 = tpu.matmul %100, %101, %cst_30 {dimension_numbers = #tpu.dot_dimension_numbers<[1], [0], [0], [1], [0, 0, 1, 1], [], []>} : vector<64x64xf32>, vector<64x32xf32>, vector<64x32xf32> -> vector<64x32xf32>
    %103 = vector.extract_strided_slice %18 {offsets = [3, 0], sizes = [1, 32], strides = [1, 1]} : vector<12x128xf32> to vector<1x32xf32>
    %104 = vector.broadcast %103 : vector<1x32xf32> to vector<64x32xf32>
    %105 = arith.addf %102, %104 : vector<64x32xf32>
    %106 = arith.addf %82, %105 : vector<64x32xf32>
    %cst_31 = arith.constant dense<0.000000e+00> : vector<64xf32>
    %107 = vector.multi_reduction <add>, %106, %cst_31 [1] : vector<64x32xf32> to vector<64xf32>
    %108 = vector.shape_cast %107 : vector<64xf32> to vector<64x1xf32>
    %cst_32 = arith.constant 3.200000e+01 : f32
    %109 = vector.broadcast %cst_32 : f32 to vector<64x1xf32>
    %110 = arith.divf %108, %109 : vector<64x1xf32>
    %111 = arith.mulf %106, %106 : vector<64x32xf32>
    %cst_33 = arith.constant dense<0.000000e+00> : vector<64xf32>
    %112 = vector.multi_reduction <add>, %111, %cst_33 [1] : vector<64x32xf32> to vector<64xf32>
    %113 = vector.shape_cast %112 : vector<64xf32> to vector<64x1xf32>
    %cst_34 = arith.constant 3.200000e+01 : f32
    %114 = vector.broadcast %cst_34 : f32 to vector<64x1xf32>
    %115 = arith.divf %113, %114 : vector<64x1xf32>
    %116 = arith.mulf %110, %110 : vector<64x1xf32>
    %117 = arith.subf %115, %116 : vector<64x1xf32>
    %118 = vector.broadcast %110 : vector<64x1xf32> to vector<64x32xf32>
    %119 = arith.subf %106, %118 : vector<64x32xf32>
    %cst_35 = arith.constant 9.99999996E-13 : f32
    %120 = vector.broadcast %cst_35 : f32 to vector<64x1xf32>
    %121 = arith.addf %117, %120 : vector<64x1xf32>
    %122 = math.rsqrt %121 : vector<64x1xf32>
    %123 = vector.broadcast %122 : vector<64x1xf32> to vector<64x32xf32>
    %124 = arith.mulf %119, %123 : vector<64x32xf32>
    %125 = vector.extract_strided_slice %18 {offsets = [6, 0], sizes = [1, 32], strides = [1, 1]} : vector<12x128xf32> to vector<1x32xf32>
    %126 = vector.broadcast %125 : vector<1x32xf32> to vector<64x32xf32>
    %127 = arith.mulf %124, %126 : vector<64x32xf32>
    %128 = vector.extract_strided_slice %18 {offsets = [7, 0], sizes = [1, 32], strides = [1, 1]} : vector<12x128xf32> to vector<1x32xf32>
    %129 = vector.broadcast %128 : vector<1x32xf32> to vector<64x32xf32>
    %130 = arith.addf %127, %129 : vector<64x32xf32>
    %131 = vector.extract_strided_slice %17 {offsets = [0, 192], sizes = [32, 32], strides = [1, 1]} : vector<32x256xf32> to vector<32x32xf32>
    %cst_36 = arith.constant dense<0.000000e+00> : vector<64x32xf32>
    %132 = tpu.matmul %130, %131, %cst_36 {dimension_numbers = #tpu.dot_dimension_numbers<[1], [0], [0], [1], [0, 0, 1, 1], [], []>} : vector<64x32xf32>, vector<32x32xf32>, vector<64x32xf32> -> vector<64x32xf32>
    %133 = vector.extract_strided_slice %18 {offsets = [8, 0], sizes = [1, 32], strides = [1, 1]} : vector<12x128xf32> to vector<1x32xf32>
    %134 = vector.broadcast %133 : vector<1x32xf32> to vector<64x32xf32>
    %135 = arith.addf %132, %134 : vector<64x32xf32>
    %136 = math.tanh %135 : vector<64x32xf32>
    %137 = vector.extract_strided_slice %17 {offsets = [0, 224], sizes = [32, 32], strides = [1, 1]} : vector<32x256xf32> to vector<32x32xf32>
    %cst_37 = arith.constant dense<0.000000e+00> : vector<64x32xf32>
    %138 = tpu.matmul %136, %137, %cst_37 {dimension_numbers = #tpu.dot_dimension_numbers<[1], [0], [0], [1], [0, 0, 1, 1], [], []>} : vector<64x32xf32>, vector<32x32xf32>, vector<64x32xf32> -> vector<64x32xf32>
    %139 = vector.extract_strided_slice %18 {offsets = [9, 0], sizes = [1, 32], strides = [1, 1]} : vector<12x128xf32> to vector<1x32xf32>
    %140 = vector.broadcast %139 : vector<1x32xf32> to vector<64x32xf32>
    %141 = arith.addf %138, %140 : vector<64x32xf32>
    %142 = math.tanh %141 : vector<64x32xf32>
    %143 = vector.extract_strided_slice %18 {offsets = [11, 0], sizes = [1, 32], strides = [1, 1]} : vector<12x128xf32> to vector<1x32xf32>
    %cst_38 = arith.constant dense<0.000000e+00> : vector<1x64xf32>
    %144 = tpu.matmul %143, %142, %cst_38 {dimension_numbers = #tpu.dot_dimension_numbers<[1], [1], [0], [0], [0, 0, 1, 0], [], []>} : vector<1x32xf32>, vector<64x32xf32>, vector<1x64xf32> -> vector<1x64xf32>
    %145 = vector.extract_strided_slice %18 {offsets = [10, 0], sizes = [1, 1], strides = [1, 1]} : vector<12x128xf32> to vector<1x1xf32>
    %146 = vector.broadcast %145 : vector<1x1xf32> to vector<1x64xf32>
    %147 = arith.addf %144, %146 : vector<1x64xf32>
    %c0_39 = arith.constant 0 : index
    %c0_40 = arith.constant 0 : index
    %148 = vector.load %arg7[%c0_39, %c0_40] : memref<1x64xf32, #tpu.memory_space<vmem>>, vector<1x64xf32>
    tpu.vector_store %arg7[%c0_39, %c0_40], %147 {strides = array<i32>} : memref<1x64xf32, #tpu.memory_space<vmem>>, vector<1x64xf32>,
    return
  }
  func.func @transform_0(%arg0: i32) -> (i32, i32) {
    %c0_i32 = arith.constant 0 : i32
    %c0_i32_0 = arith.constant 0 : i32
    %c0_i32_1 = arith.constant 0 : i32
    return %c0_i32, %c0_i32_0 : i32, i32
  }
  func.func @transform_1(%arg0: i32) -> (i32, i32) {
    %c0_i32 = arith.constant 0 : i32
    %c0_i32_0 = arith.constant 0 : i32
    %c0_i32_1 = arith.constant 0 : i32
    return %c0_i32, %c0_i32_0 : i32, i32
  }
  func.func @transform_2(%arg0: i32) -> (i32, i32) {
    %c0_i32 = arith.constant 0 : i32
    %c0_i32_0 = arith.constant 0 : i32
    %c0_i32_1 = arith.constant 0 : i32
    return %c0_i32, %c0_i32_0 : i32, i32
  }
  func.func @transform_3(%arg0: i32) -> (i32, i32) {
    %c0_i32 = arith.constant 0 : i32
    %c0_i32_0 = arith.constant 0 : i32
    %c0_i32_1 = arith.constant 0 : i32
    return %c0_i32, %c0_i32_0 : i32, i32
  }
  func.func @transform_4(%arg0: i32) -> (i32, i32) {
    %c0_i32 = arith.constant 0 : i32
    %c0_i32_0 = arith.constant 0 : i32
    %c0_i32_1 = arith.constant 0 : i32
    return %c0_i32, %c0_i32_0 : i32, i32
  }
  func.func @transform_5(%arg0: i32) -> (i32, i32) {
    %c0_i32 = arith.constant 0 : i32
    %c0_i32_0 = arith.constant 0 : i32
    %c0_i32_1 = arith.constant 0 : i32
    return %c0_i32, %c0_i32_0 : i32, i32
  }
  func.func @transform_6(%arg0: i32) -> (i32, i32) {
    %c0_i32 = arith.constant 0 : i32
    %c0_i32_0 = arith.constant 0 : i32
    %c0_i32_1 = arith.constant 0 : i32
    return %c0_i32, %c0_i32_0 : i32, i32
  }
}

</mosaic_0001>

<bundles_post_ra>
// kernel: squeeze.2
= control target key start
LH: loop header
LB: loop body
LE: loop exit
PB: predicated region body
PF: predicated region fallthrough
CT: control target
= control target key end

     0   :  { %s66_s8 = smov 104   ;;  %vm7_vm0 = vcmask 64512   ;;  %s67_s11 = smov 112   ;;  %s117_s0 = inlined_call_operand.vmem [shape: f32[64], index: 0, kind: input, shape index: {}]   ;;  %s118_s1 = inlined_call_operand.vmem [shape: f32[8,8], index: 1, kind: output, shape index: {}]  }
   0x1   :  { %v4_v0 = vld [vmem:[%s117_s0] sm:$0x1]  ;;  %s65_s0 = smov 120   ;;  %s68_s12 = smov 96  }
   0x2   :  { %5 = vst [vmem:[#allocation0] sm:$0x1] %v4_v0  ;;  %s69_s13 = smov 88   ;;  %s70_s14 = smov 80  }
   0x3   :  { %s71_s15 = smov 72  }
   0x9   :  { %v9_v1 = vld [vmem:[#allocation0] sm:$0x1]  }
   0xa   :  { %v21_v2 = vld [vmem:[#allocation0] sm:$0x1]   ;;  %10 = vrot.lane.b32.xlu0 %v9_v1, %s65_s0 }
   0xb   :  { %22 = vrot.lane.b32.xlu1 %v21_v2, %s66_s8  ;;  %v15_v3 = vld [vmem:[#allocation0] sm:$0x1]  }
   0xc   :  { %v27_v4 = vld [vmem:[#allocation0] sm:$0x1]  }
   0xd   :  { %v6_v5 = vld [vmem:[#allocation0] sm:$0x1]  }
   0xe   :  { %8 = vst.msk [vmem:[%s118_s1] sm:$0x1] %vm7_vm0, %v6_v5   ;;  %16 = vrot.lane.b32.xlu0 %v15_v3, %s67_s11  ;;  %v33_v6 = vld [vmem:[#allocation0] sm:$0x1]  }
   0xf   :  { %28 = vrot.lane.b32.xlu1 %v27_v4, %s68_s12  ;;  %v39_v7 = vld [vmem:[#allocation0] sm:$0x1]  }
  0x10   :  { %v45_v8 = vld [vmem:[#allocation0] sm:$0x1]  }
  0x12   :  { %34 = vrot.lane.b32.xlu0 %v33_v6, %s69_s13 }
  0x13   :  { %40 = vrot.lane.b32.xlu1 %v39_v7, %s70_s14 }
  0x16   :  { %46 = vrot.lane.b32.xlu0 %v45_v8, %s71_s15 }
  0x7c   :  { %v11_v9 = vpop.permute.xlu0 %10  }
  0x7d   :  { %v23_v10 = vpop.permute.xlu1 %22   ;;  %51 = vst.msk [vmem:[%s118_s1 + $0x1] sm:$0x1] %vm7_vm0, %v11_v9  }
  0x7e   :  { %53 = vst.msk [vmem:[%s118_s1 + $0x3] sm:$0x1] %vm7_vm0, %v23_v10  }
  0x80   :  { %v17_v11 = vpop.permute.xlu0 %16  }
  0x81   :  { %v29_v12 = vpop.permute.xlu1 %28   ;;  %52 = vst.msk [vmem:[%s118_s1 + $0x2] sm:$0x1] %vm7_vm0, %v17_v11  }
  0x82   :  { %54 = vst.msk [vmem:[%s118_s1 + $0x4] sm:$0x1] %vm7_vm0, %v29_v12  }
  0x84   :  { %v35_v13 = vpop.permute.xlu0 %34  }
  0x85   :  { %v41_v14 = vpop.permute.xlu1 %40   ;;  %55 = vst.msk [vmem:[%s118_s1 + $0x5] sm:$0x1] %vm7_vm0, %v35_v13  }
  0x86   :  { %56 = vst.msk [vmem:[%s118_s1 + $0x6] sm:$0x1] %vm7_vm0, %v41_v14  }
  0x88   :  { %v47_v15 = vpop.permute.xlu0 %46  }
  0x89   :  { %57 = vst.msk [vmem:[%s118_s1 + $0x7] sm:$0x1] %vm7_vm0, %v47_v15  }

// kernel: squeeze.3
= control target key start
LH: loop header
LB: loop body
LE: loop exit
PB: predicated region body
PF: predicated region fallthrough
CT: control target
= control target key end

     0   :  { %s85_s0 = inlined_call_operand.vmem [shape: f32[8], index: 0, kind: input, shape index: {}]   ;;  %s86_s1 = inlined_call_operand.hbm [shape: f32[2,4], index: 1, kind: output, shape index: {}]  }
   0x1   :  { %v5_v0 = vld [vmem:[%s85_s0] sm:$0x1] }
   0x2   :  { %2 = vsyncpa [#allocation1], 0  ;;  %6 = vst [vmem:[#allocation3] sm:$0x1] %v5_v0  ;;  %vm8_vm0 = vcmask 31744   ;;  %s58_s0 = smov 124  }
   0x3   :  { %s59_s8 = smov [#allocation0]  }
   0x4   :  { %s26_s9 = sshll.u32 %s59_s8, 4  ;;  %s27_s9 = int_to_ptr.vmem [resolvable:$true] %s26_s9 }
   0x5   :  { %s34_s10 = scalar_lea.vmem %s27_s9, 32  ;;  %p39_p1 = scmp.lt.s32.totalorder %s27_s9, %s27_s9 }
   0x6   :  { %p35_p0 = scmp.ne.s32.totalorder %s27_s9, %s34_s10  ;;  %p40_p2 = scmp.lt.s32.totalorder %s34_s10, %s34_s10 }
   0x8   :  { %p41_p3 = por %p40_p2, %p39_p1 }
   0x9   :  { %v10_v1 = vld [vmem:[#allocation3] sm:$0x1]  }
   0xa   :  { %v7_v2 = vld [vmem:[#allocation3] sm:$0x1]   ;;  %11 = vrot.lane.b32.xlu0 %v10_v1, %s58_s0  ;;  %p42_p4 = pnand %p41_p3, %p35_p0 }
   0xb   :  { %9 = vst.msk [vmem:[#allocation2] sm:$0x1] %vm8_vm0, %v7_v2  }
  0x7c   :  { %v12_v3 = vpop.permute.xlu0 %11  }
  0x7d   :  { %15 = vst.msk [vmem:[#allocation2 + $0x1] sm:$0x1] %vm8_vm0, %v12_v3  }
  0x84   :  { %v19_v4 = vld [vmem:[#allocation2] sm:$0x3] }
  0x85   :  { %21 = vst [vmem:[#allocation0] sm:$0x3] %v19_v4 }
  0x86   :  { %45 = shalt.err (!%p42_p4)
}
  0x87   :  { %s46_s13 = scalar_lea.hbm %s86_s1, 32 }
  0x88   :  { %p47_p5 = scmp.ne.s32.totalorder %s86_s1, %s46_s13  ;;  %p50_p6 = scmp.lt.u32.totalorder %s46_s13, %s86_s1 }
  0x8a   :  { %p52_p7 = pnand %p50_p6, %p47_p5 }
  0x8c   :  { %55 = shalt.err (!%p52_p7)
}
  0x8d   :  { %29 = dma.vmem_to_hbm [thread:$0]  %s27_s9, 32, %s86_s1, [#allocation1]  }
  0x8e   :  { %56 = dma.done.wait [#allocation1], 32  }
  0x8f   :  { %57 = vsyncadd [#allocation1], 4294967264 }
  0x90   :  { %31 = vsyncpa [#allocation1], 1 }

// kernel: multiple_choice_forward.1
= control target key start
LH: loop header
LB: loop body
LE: loop exit
PB: predicated region body
PF: predicated region fallthrough
CT: control target
= control target key end

     0   :  { %v3912_v0 = vmov 1   ;;  %v3913_v1 = vmov 0   ;;  %v3914_v14 = vmov 2   ;;  %vm200_vm0 = vcmask 1045504   ;;  %s3918_s25 = smov 96   ;;  %s3921_s28 = smov 32   ;;  %s4750_s0 = inlined_call_operand.vmem [shape: s32[64,3], index: 0, kind: input, shape index: {}]   ;;  %s4751_s2 = inlined_call_operand.vmem [shape: f32[110,32], index: 2, kind: input, shape index: {}]   ;;  %s4752_s3 = inlined_call_operand.vmem [shape: f32[32,256], index: 3, kind: input, shape index: {}]   ;;  %s4753_s5 = inlined_call_operand.vmem [shape: f32[12,128], index: 5, kind: input, shape index: {}]   ;;  %s4754_s1 = inlined_call_operand.vmem [shape: f32[8,8], index: 1, kind: input, shape index: {}]   ;;  %s4755_s4 = inlined_call_operand.vmem [shape: f32[64,32], index: 4, kind: input, shape index: {}]   ;;  %s4756_s6 = inlined_call_operand.vmem [shape: f32[1,64], index: 6, kind: output, shape index: {}]  }
   0x1   :  { %3750 = vset.pattern.permute.xlu0 %v3912_v0  ;;  %3752 = vset.pattern.permute.xlu1 %v3913_v1  ;;  %v24_v2 = vld [vmem:[%s4750_s0 + $0x8] sm:$0xff]  ;;  %v23_v3 = vld [vmem:[%s4750_s0] sm:$0xff]  ;;  %v163_v6 = vld [vmem:[%s4751_s2 + $0x10] sm:$0xff]  ;;  %vm3915_vm1 = vmmov 1   ;;  %v3916_v31 = vmov 0.0   ;;  %v31_v40 = vlaneseq  ;;  %vm175_vm7 = vcmask 900096  }
   0x2   :  { %37 = vperm.xlu1 %3752, %v24_v2   ;;  %66 = vperm.xlu0 %3750, %v23_v3   ;;  %v161_v4 = vld [vmem:[%s4751_s2] sm:$0xff]  ;;  %v162_v5 = vld [vmem:[%s4751_s2 + $0x8] sm:$0xff]  ;;  %v164_v7 = vld [vmem:[%s4751_s2 + $0x18] sm:$0xff] }
   0x3   :  { %v3637_v8 = vpack.c.bf16 %v162_v5, %v161_v4  ;;  %v3641_v9 = vpack.c.bf16 %v164_v7, %v163_v6  ;;  %v165_v10 = vld [vmem:[%s4751_s2 + $0x20] sm:$0xff]  ;;  %v166_v11 = vld [vmem:[%s4751_s2 + $0x28] sm:$0xff]  ;;  %v26_v12 = vld [vmem:[%s4750_s0 + $0x18] sm:$0xff]  ;;  %v4071_v43 = vand.u32 127, %v31_v40 }
   0x4   :  { %v3645_v13 = vpack.c.bf16 %v166_v11, %v165_v10  ;;  %v167_v15 = vld [vmem:[%s4751_s2 + $0x30] sm:$0xff]  ;;  %v168_v16 = vld [vmem:[%s4751_s2 + $0x38] sm:$0xff]  ;;  %v169_v19 = vld [vmem:[%s4751_s2 + $0x40] sm:$0xff] }
   0x5   :  { %3638 = vmatprep.subr.bf16.mxu0 %v3637_v8  ;;  %v25_v17 = vld [vmem:[%s4750_s0 + $0x10] sm:$0xff]  ;;  %v3649_v18 = vpack.c.bf16 %v168_v16, %v167_v15  ;;  %v170_v20 = vld [vmem:[%s4751_s2 + $0x48] sm:$0xff]  ;;  %v172_v23 = vld [vmem:[%s4751_s2 + $0x58] sm:$0xff] }
   0x6   :  { %3753 = vset.pattern.permute.xlu1 %v3912_v0  ;;  %3751 = vset.pattern.permute.xlu0 %v3913_v1  ;;  %v3653_v21 = vpack.c.bf16 %v170_v20, %v169_v19  ;;  %v171_v22 = vld [vmem:[%s4751_s2 + $0x50] sm:$0xff]  ;;  %v28_v24 = vld [vmem:[%s4750_s0 + $0x28] sm:$0xff]  ;;  %v173_v26 = vld [vmem:[%s4751_s2 + $0x60] sm:$0xff] }
   0x7   :  { %69 = vperm.xlu1 %3753, %v24_v2   ;;  %34 = vperm.xlu0 %3751, %v23_v3   ;;  %v3657_v25 = vpack.c.bf16 %v172_v23, %v171_v22  ;;  %v174_v27 = vld [vmem:[%s4751_s2 + $0x68] sm:$0x3f]  ;;  %vm3662_vm2 = vmpackc.low %vm200_vm0, %vm3915_vm1  ;;  %v30_v29 = vld [vmem:[%s4750_s0 + $0x38] sm:$0xff] }
   0x8   :  { %3640 = vmatpush3.bf16.msra.mxu0 %v3637_v8  ;;  %v3661_v28 = vpack.c.bf16 %v174_v27, %v173_v26  ;;  %v27_v30 = vld [vmem:[%s4750_s0 + $0x20] sm:$0xff]  ;;  %v29_v32 = vld [vmem:[%s4750_s0 + $0x30] sm:$0xff] }
   0x9   :  { %3642 = vmatprep.subr.bf16.mxu0 %v3641_v9  ;;  %v4046_v33 = vld [vmem:[%s4752_s3] sm:$0xff]  ;;  %v4051_v34 = vld [vmem:[%s4752_s3 + $0x10] sm:$0xff] }
   0xa   :  { %v4056_v35 = vld [vmem:[%s4752_s3 + $0x20] sm:$0xff]  ;;  %v3767_v36 = vpack.i.bf16 %v4051_v34, %v4046_v33  ;;  %v3667_v37 = vpack.c.bf16 %v4051_v34, %v4046_v33  ;;  %v4065_v38 = vld [vmem:[%s4752_s3 + $0x30] sm:$0xff] }
   0xb   :  { %3754 = vset.pattern.permute.xlu1 %v3914_v14  ;;  %43 = vperm.xlu0 %3751, %v26_v12   ;;  %v3671_v39 = vpack.c.bf16 %v4065_v38, %v4056_v35  ;;  %v4158_v20 = vld [vmem:[%s4753_s5] sm:$0xff] }
   0xc   :  { %106 = vperm.xlu1 %3754, %v23_v3   ;;  %3644 = vmatpush3.bf16.msra.mxu0 %v3641_v9 }
   0xd   :  { %3646 = vmatprep.subr.bf16.mxu0 %v3645_v13  ;;  %3668 = vmatprep.subr.bf16.mxu1 %v3667_v37 }
   0xe   :  { %3670 = vmatpush3.bf16.msra.mxu1 %v3667_v37 }
   0xf   :  { %3757 = vset.pattern.permute.xlu0 %v3914_v14  ;;  %3672 = vmatprep.subr.bf16.mxu1 %v3671_v39 }
  0x10   :  { %3755 = vset.pattern.permute.xlu1 %v3913_v1  ;;  %109 = vperm.xlu0 %3757, %v24_v2  }
  0x11   :  { %40 = vperm.xlu1 %3755, %v25_v17   ;;  %3648 = vmatpush3.bf16.msra.mxu0 %v3645_v13 }
  0x12   :  { %3650 = vmatprep.subr.bf16.mxu0 %v3649_v18  ;;  %3674 = vmatpush3.bf16.msra.mxu1 %v3671_v39 }
  0x13   :  { %3430 = vmatprep.subr.mxu1 %v3916_v31 }
  0x14   :  { %115 = vperm.xlu0 %3757, %v26_v12  }
  0x15   :  { %3756 = vset.pattern.permute.xlu1 %v3912_v0  ;;  %3652 = vmatpush3.bf16.msra.mxu0 %v3649_v18  ;;  %v4146_v18 = vshrl.u32 %v31_v40, 7 }
  0x16   :  { %72 = vperm.xlu1 %3756, %v25_v17   ;;  %3654 = vmatprep.subr.bf16.mxu0 %v3653_v21 }
  0x17   :  { %v4153_v19 = vsub.s32 0, %v4146_v18 }
  0x18   :  { %121 = vperm.xlu0 %3757, %v28_v24  }
  0x19   :  { %3656 = vmatpush3.bf16.msra.mxu0 %v3653_v21  ;;  %v322_v21 = vrot.slane %v4158_v20, %v4153_v19 }
  0x1a   :  { %75 = vperm.xlu1 %3756, %v26_v12   ;;  %3658 = vmatprep.subr.bf16.mxu0 %v3657_v25 }
  0x1c   :  { %3762 = vset.pattern.permute.xlu0 %v3913_v1 }
  0x1d   :  { %49 = vperm.xlu0 %3762, %v28_v24   ;;  %3660 = vmatpush3.bf16.msra.mxu0 %v3657_v25 }
  0x1e   :  { %3758 = vset.pattern.permute.xlu1 %v3914_v14  ;;  %3663 = vmatprep.subr.msk.bf16.mxu0 %vm3662_vm2, %v3661_v28 }
  0x1f   :  { %112 = vperm.xlu1 %3758, %v25_v17  }
  0x21   :  { %55 = vperm.xlu0 %3762, %v30_v29   ;;  %3666 = vmatpush3.bf16.msk.msra.mxu0 %vm3662_vm2, %v3661_v28 }
  0x22   :  { %3465 = vmatprep.subr.mxu0 %v3916_v31 }
  0x23   :  { %3759 = vset.pattern.permute.xlu1 %v3913_v1 }
  0x24   :  { %46 = vperm.xlu1 %3759, %v27_v30  }
  0x25   :  { %3766 = vset.pattern.permute.xlu0 %v3914_v14 }
  0x26   :  { %127 = vperm.xlu0 %3766, %v30_v29  }
  0x28   :  { %3760 = vset.pattern.permute.xlu1 %v3912_v0 }
  0x29   :  { %78 = vperm.xlu1 %3760, %v27_v30  }
  0x2a   :  { %3797 = vset.pattern.permute.xlu0 %v3913_v1 }
  0x2d   :  { %81 = vperm.xlu1 %3760, %v28_v24  }
  0x31   :  { %3761 = vset.pattern.permute.xlu1 %v3914_v14 }
  0x32   :  { %118 = vperm.xlu1 %3761, %v27_v30  }
  0x36   :  { %3763 = vset.pattern.permute.xlu1 %v3913_v1 }
  0x37   :  { %52 = vperm.xlu1 %3763, %v29_v32  }
  0x3b   :  { %3764 = vset.pattern.permute.xlu1 %v3912_v0 }
  0x3c   :  { %84 = vperm.xlu1 %3764, %v29_v32  }
  0x40   :  { %87 = vperm.xlu1 %3764, %v30_v29  }
  0x44   :  { %3765 = vset.pattern.permute.xlu1 %v3914_v14 }
  0x45   :  { %124 = vperm.xlu1 %3765, %v29_v32  }
  0x81   :  { %v38_v41 = vpop.permute.xlu1 %37  ;;  %v67_v42 = vpop.permute.xlu0 %66 }
  0x82   :  { %vm89_vm3 = vcmp.eq.s32.totalorder %v4071_v43, %v67_v42  ;;  %vm58_vm10 = vcmp.eq.s32.totalorder %v4071_v43, %v38_v41 }
  0x86   :  { %v70_v44 = vpop.permute.xlu1 %69  ;;  %v35_v45 = vpop.permute.xlu0 %34 }
  0x87   :  { %vm57_vm4 = vcmp.eq.s32.totalorder %v4071_v43, %v35_v45  ;;  %vm90_vm8 = vcmp.eq.s32.totalorder %v4071_v43, %v70_v44 }
  0x88   :  { %vm97_vm5 = vmor %vm57_vm4, %vm89_vm3 }
  0x89   :  { %vm98_vm11 = vmor %vm58_vm10, %vm90_vm8 }
  0x8a   :  { %v44_v46 = vpop.permute.xlu0 %43 }
  0x8b   :  { %v107_v47 = vpop.permute.xlu1 %106  ;;  %vm60_vm14 = vcmp.eq.s32.totalorder %v4071_v43, %v44_v46 }
  0x8c   :  { %vm129_vm6 = vcmp.eq.s32.totalorder %v4071_v43, %v107_v47 }
  0x8d   :  { %vm137_vm9 = vmor %vm97_vm5, %vm129_vm6 }
  0x8e   :  { %v3125_v48 = vsel %vm137_vm9, 1.0, %v3916_v31 }
  0x8f   :  { %3398 = vmatprep.mubr.msk.f32.mxu0 %vm175_vm7, %v3125_v48  ;;  %v110_v49 = vpop.permute.xlu0 %109 }
  0x90   :  { %vm130_vm12 = vcmp.eq.s32.totalorder %v4071_v43, %v110_v49  ;;  %v41_v50 = vpop.permute.xlu1 %40 }
  0x91   :  { %vm138_vm13 = vmor %vm98_vm11, %vm130_vm12  ;;  %vm59_vm3 = vcmp.eq.s32.totalorder %v4071_v43, %v41_v50 }
  0x92   :  { %v3126_v51 = vsel %vm138_vm13, 1.0, %v3916_v31 }
  0x93   :  { %3399 = vmatmul.mubr.msk.f32.vlgmr.msra.gmra.mrb[0].mxu0 %vm175_vm7, %v3126_v51  ;;  %v116_v54 = vpop.permute.xlu0 %115 }
  0x94   :  { %vm132_vm2 = vcmp.eq.s32.totalorder %v4071_v43, %v116_v54 }
  0x95   :  { %v73_v52 = vpop.permute.xlu1 %72 }
  0x96   :  { %vm91_vm0 = vcmp.eq.s32.totalorder %v4071_v43, %v73_v52  ;;  %v3919_v52 = vmov 1966171168  }
  0x97   :  { %vm99_vm4 = vmor %vm59_vm3, %vm91_vm0  ;;  %v122_v59 = vpop.permute.xlu0 %121 }
  0x99   :  { %v76_v53 = vpop.permute.xlu1 %75 }
  0x9a   :  { %vm92_vm15 = vcmp.eq.s32.totalorder %v4071_v43, %v76_v53  ;;  %v1081_v53 = vunpack.c.l.s4 %v3919_v52 }
  0x9b   :  { %vm100_vm1 = vmor %vm60_vm14, %vm92_vm15  ;;  %vm134_vm14 = vcmp.eq.s32.totalorder %v4071_v43, %v122_v59 }
  0x9c   :  { %vm140_vm5 = vmor %vm100_vm1, %vm132_vm2  ;;  %v50_v61 = vpop.permute.xlu0 %49  ;;  %v1082_v54 = vunpack.c.0.s8 %v1081_v53 }
  0x9d   :  { %v3128_v57 = vsel %vm140_vm5, 1.0, %v3916_v31  ;;  %vm62_vm9 = vcmp.eq.s32.totalorder %v4071_v43, %v50_v61 }
  0x9e   :  { %v113_v55 = vpop.permute.xlu1 %112 }
  0x9f   :  { %vm131_vm6 = vcmp.eq.s32.totalorder %v4071_v43, %v113_v55  ;;  %v1085_v55 = vsub.s32 %v1082_v54, %v4146_v18 }
  0xa0   :  { %vm139_vm8 = vmor %vm99_vm4, %vm131_vm6  ;;  %v56_v3 = vpop.permute.xlu0 %55 }
  0xa1   :  { %v3127_v56 = vsel %vm139_vm8, 1.0, %v3916_v31  ;;  %vm64_vm6 = vcmp.eq.s32.totalorder %v4071_v43, %v56_v3 }
  0xa2   :  { %3401 = vmatprep.mubr.msk.f32.mxu0 %vm175_vm7, %v3127_v56  ;;  %v1077_v56 = vld [vmem:[%s4754_s1] sm:$0xff]  ;;  %s3920_s1 = smov 64  }
  0xa3   :  { %v47_v58 = vpop.permute.xlu1 %46  ;;  %3402 = vmatmul.mubr.msk.f32.gmra.mrb[2].mxu0 %vm175_vm7, %v3128_v57  ;;  %v1086_v57 = vrot.slane %v1077_v56, %v1085_v55 }
  0xa4   :  { %vm61_vm13 = vcmp.eq.s32.totalorder %v4071_v43, %v47_v58 }
  0xa5   :  { %v128_v6 = vpop.permute.xlu0 %127  ;;  %v1102_v58 = vrot.slane %v1086_v57, %v1085_v55  ;;  %v1094_v59 = vcombine.high %v1086_v57, %v1086_v57 }
  0xa7   :  { %v1116_v61 = vrot.slane %v1094_v59, %v1085_v55 }
  0xa8   :  { %v79_v60 = vpop.permute.xlu1 %78 }
  0xa9   :  { %vm93_vm11 = vcmp.eq.s32.totalorder %v4071_v43, %v79_v60  ;;  %v3166_v60 = vadd.f32 -1.0, %v1102_v58 }
  0xaa   :  { %vm101_vm15 = vmor %vm61_vm13, %vm93_vm11 }
  0xac   :  { %v82_v62 = vpop.permute.xlu1 %81 }
  0xad   :  { %vm94_vm10 = vcmp.eq.s32.totalorder %v4071_v43, %v82_v62  ;;  %v1144_v62 = vmul.f32 1e+09, %v3166_v60 }
  0xae   :  { %vm102_vm12 = vmor %vm62_vm9, %vm94_vm10  ;;  %vm136_vm9 = vcmp.eq.s32.totalorder %v4071_v43, %v128_v6 }
  0xaf   :  { %vm142_vm0 = vmor %vm102_vm12, %vm134_vm14  ;;  %vm323_vm14 = vcmask 261120  }
  0xb0   :  { %v3130_v1 = vsel %vm142_vm0, 1.0, %v3916_v31  ;;  %vm2424_vm0 = vcmask 523264  }
  0xb1   :  { %v119_v63 = vpop.permute.xlu1 %118 }
  0xb2   :  { %vm133_vm1 = vcmp.eq.s32.totalorder %v4071_v43, %v119_v63  ;;  %v3167_v63 = vadd.f32 -1.0, %v1116_v61 }
  0xb3   :  { %vm141_vm2 = vmor %vm101_vm15, %vm133_vm1  ;;  %vm1208_vm15 = vcmask 64512  }
  0xb4   :  { %v3129_v0 = vsel %vm141_vm2, 1.0, %v3916_v31  ;;  %vm4733_vm1 = vmpackc.low %vm323_vm14, %vm323_vm14  ;;  %vm3119_vm2 = vcmask 516096  }
  0xb5   :  { %3404 = vmatprep.mubr.msk.f32.mxu0 %vm175_vm7, %v3129_v0  ;;  %v1163_v0 = vrot.slane %v1144_v62, %v4153_v19 }
  0xb6   :  { %3405 = vmatmul.mubr.msk.f32.gmra.mrb[4].mxu0 %vm175_vm7, %v3130_v1  ;;  %v53_v2 = vpop.permute.xlu1 %52  ;;  %v1145_v1 = vmul.f32 1e+09, %v3167_v63 }
  0xb7   :  { %vm63_vm3 = vcmp.eq.s32.totalorder %v4071_v43, %v53_v2 }
  0xb8   :  { %v1167_v6 = vrot.slane %v1145_v1, %v4153_v19 }
  0xbb   :  { %v85_v4 = vpop.permute.xlu1 %84 }
  0xbc   :  { %vm95_vm4 = vcmp.eq.s32.totalorder %v4071_v43, %v85_v4 }
  0xbd   :  { %vm103_vm10 = vmor %vm63_vm3, %vm95_vm4 }
  0xbf   :  { %v88_v5 = vpop.permute.xlu1 %87 }
  0xc0   :  { %vm96_vm5 = vcmp.eq.s32.totalorder %v4071_v43, %v88_v5 }
  0xc1   :  { %vm104_vm8 = vmor %vm64_vm6, %vm96_vm5 }
  0xc2   :  { %vm144_vm11 = vmor %vm104_vm8, %vm136_vm9 }
  0xc3   :  { %v3132_v9 = vsel %vm144_vm11, 1.0, %v3916_v31 }
  0xc4   :  { %v125_v7 = vpop.permute.xlu1 %124 }
  0xc5   :  { %vm135_vm12 = vcmp.eq.s32.totalorder %v4071_v43, %v125_v7  ;;  %v1124_v7 = vcombine.high %v1102_v58, %v1102_v58 }
  0xc6   :  { %vm143_vm13 = vmor %vm103_vm10, %vm135_vm12 }
  0xc7   :  { %v3131_v8 = vsel %vm143_vm13, 1.0, %v3916_v31 }
  0xc8   :  { %3407 = vmatprep.mubr.msk.f32.mxu0 %vm175_vm7, %v3131_v8 }
  0xc9   :  { %3408 = vmatmul.mubr.msk.f32.gmra.mrb[6].mxu0 %vm175_vm7, %v3132_v9  ;;  %vm3917_vm7 = vmmov 0  }
  0xca   :  { %3467 = vmatprep.mubr.msk.f32.mxu0 %vm3917_vm7, %v3916_v31 }
 0x166   :  { %v4113_v10 = vpop.f32.mrb[0].mxu0 }
 0x167   :  { %v4115_v11 = vpop.f32.mrb[1].mxu0 }
 0x168   :  { %3418 = vmatprep.mubr.msk.f32.mxu1 %vm323_vm14, %v4115_v11 }
 0x169   :  { %3419 = vmatmul.mubr.msk.f32.vlgmr.msra.gmra.mrb[0].mxu1 %vm323_vm14, %v4113_v10 }
 0x176   :  { %v4121_v12 = vpop.f32.mrb[2].mxu0 }
 0x177   :  { %v4123_v13 = vpop.f32.mrb[3].mxu0 }
 0x178   :  { %3421 = vmatprep.mubr.msk.f32.mxu1 %vm323_vm14, %v4123_v13 }
 0x179   :  { %3422 = vmatmul.mubr.msk.f32.gmra.mrb[2].mxu1 %vm323_vm14, %v4121_v12 }
 0x189   :  { %v4129_v14 = vpop.f32.mrb[4].mxu0 }
 0x18a   :  { %v4131_v15 = vpop.f32.mrb[5].mxu0 }
 0x18b   :  { %3424 = vmatprep.mubr.msk.f32.mxu1 %vm323_vm14, %v4131_v15 }
 0x18c   :  { %3425 = vmatmul.mubr.msk.f32.gmra.mrb[4].mxu1 %vm323_vm14, %v4129_v14 }
 0x19c   :  { %v4137_v16 = vpop.f32.mrb[6].mxu0 }
 0x19d   :  { %v4139_v17 = vpop.f32.mrb[7].mxu0 }
 0x19e   :  { %3427 = vmatprep.mubr.msk.f32.mxu1 %vm323_vm14, %v4139_v17 }
 0x19f   :  { %3428 = vmatmul.mubr.msk.f32.gmra.mrb[6].mxu1 %vm323_vm14, %v4137_v16 }
 0x1a0   :  { %3432 = vmatprep.mubr.msk.f32.mxu1 %vm3917_vm7, %v3916_v31 }
 0x23c   :  { %v3420_v22 = vpop.f32.mrb[0].mxu1 }
 0x23d   :  { %v414_v23 = vpop.f32.mrb[1].mxu1  ;;  %v4165_v25 = vadd.f32 %v3420_v22, %v322_v21 }
 0x23e   :  { %v4162_v24 = vadd.f32 %v414_v23, %v322_v21 }
 0x240   :  { %454 = vrot.lane.b32.xlu1 %v4162_v24, %s3918_s25 }
 0x244   :  { %531 = vrot.lane.b32.xlu1 %v4165_v25, %s3918_s25 }
 0x24c   :  { %v3423_v26 = vpop.f32.mrb[2].mxu1 }
 0x24d   :  { %v4168_v27 = vadd.f32 %v3423_v26, %v322_v21  ;;  %v424_v28 = vpop.f32.mrb[3].mxu1  ;;  %v3168_v26 = vadd.f32 -1.0, %v1124_v7 }
 0x24e   :  { %v4170_v29 = vadd.f32 %v424_v28, %v322_v21  ;;  %v1126_v28 = vcombine.high %v1116_v61, %v1116_v61 }
 0x24f   :  { %685 = vrot.lane.b32.xlu1 %v4168_v27, %s3918_s25 }
 0x250   :  { %608 = vrot.lane.b32.xlu0 %v4170_v29, %s3918_s25 }
 0x25f   :  { %v3426_v30 = vpop.f32.mrb[4].mxu1 }
 0x260   :  { %v4174_v32 = vadd.f32 %v3426_v30, %v322_v21  ;;  %v434_v37 = vpop.f32.mrb[5].mxu1 }
 0x261   :  { %v4176_v39 = vadd.f32 %v434_v37, %v322_v21  ;;  %v1146_v37 = vmul.f32 1e+09, %v3168_v26 }
 0x262   :  { %839 = vrot.lane.b32.xlu1 %v4174_v32, %s3918_s25 }
 0x263   :  { %762 = vrot.lane.b32.xlu0 %v4176_v39, %s3918_s25 }
 0x272   :  { %v3429_v40 = vpop.f32.mrb[6].mxu1 }
 0x273   :  { %v4180_v41 = vadd.f32 %v3429_v40, %v322_v21  ;;  %v444_v42 = vpop.f32.mrb[7].mxu1  ;;  %v3169_v40 = vadd.f32 -1.0, %v1126_v28 }
 0x274   :  { %v4182_v43 = vadd.f32 %v444_v42, %v322_v21  ;;  %v1079_v42 = vcombine.high %v1077_v56, %v1077_v56 }
 0x275   :  { %993 = vrot.lane.b32.xlu1 %v4180_v41, %s3918_s25 }
 0x276   :  { %916 = vrot.lane.b32.xlu0 %v4182_v43, %s3918_s25 }
 0x2b2   :  { %v455_v44 = vpop.permute.xlu1 %454 }
 0x2b3   :  { %3431 = vmatpush3.xpose.msk.msra.mxu1 %vm323_vm14, %v455_v44  ;;  %v1171_v44 = vrot.slane %v1146_v37, %v4153_v19 }
 0x2b4   :  { %3435 = vmatprep.subr.mxu1 %v3916_v31 }
 0x2b6   :  { %v532_v45 = vpop.permute.xlu1 %531  ;;  %3433 = vmatmul.mubr.msk.f32.vlgmr.msra.gmra.mrb[8].mxu1 %vm323_vm14, %v4162_v24 }
 0x2b7   :  { %3436 = vmatpush3.xpose.msk.msra.mxu1 %vm323_vm14, %v532_v45  ;;  %3437 = vmatprep.mubr.msk.f32.mxu1 %vm3917_vm7, %v3916_v31  ;;  %v1147_v45 = vmul.f32 1e+09, %v3169_v40 }
 0x2b8   :  { %3440 = vmatprep.subr.mxu1 %v3916_v31 }
 0x2ba   :  { %3438 = vmatmul.mubr.msk.f32.vlgmr.msra.gmra.mrb[10].mxu1 %vm323_vm14, %v4165_v25 }
 0x2bb   :  { %3442 = vmatprep.mubr.msk.f32.mxu1 %vm3917_vm7, %v3916_v31 }
 0x2c1   :  { %v686_v47 = vpop.permute.xlu1 %685 }
 0x2c2   :  { %v609_v46 = vpop.permute.xlu0 %608 }
 0x2c3   :  { %3441 = vmatpush3.xpose.msk.msra.mxu1 %vm323_vm14, %v609_v46 }
 0x2c4   :  { %3445 = vmatprep.subr.mxu1 %v3916_v31 }
 0x2c6   :  { %3443 = vmatmul.mubr.msk.f32.vlgmr.msra.gmra.mrb[12].mxu1 %vm323_vm14, %v4170_v29 }
 0x2c7   :  { %3446 = vmatpush3.xpose.msk.msra.mxu1 %vm323_vm14, %v686_v47  ;;  %3447 = vmatprep.mubr.msk.f32.mxu1 %vm3917_vm7, %v3916_v31 }
 0x2c8   :  { %3450 = vmatprep.subr.mxu1 %v3916_v31 }
 0x2ca   :  { %3448 = vmatmul.mubr.msk.f32.vlgmr.msra.gmra.mrb[14].mxu1 %vm323_vm14, %v4168_v27 }
 0x2cb   :  { %3452 = vmatprep.mubr.msk.f32.mxu1 %vm3917_vm7, %v3916_v31 }
 0x2d4   :  { %v840_v49 = vpop.permute.xlu1 %839 }
 0x2d5   :  { %v763_v48 = vpop.permute.xlu0 %762 }
 0x2d6   :  { %3451 = vmatpush3.xpose.msk.msra.mxu1 %vm323_vm14, %v763_v48 }
 0x2d7   :  { %3455 = vmatprep.subr.mxu1 %v3916_v31 }
 0x2d9   :  { %3453 = vmatmul.mubr.msk.f32.vlgmr.msra.gmra.mrb[16].mxu1 %vm323_vm14, %v4176_v39 }
 0x2da   :  { %3456 = vmatpush3.xpose.msk.msra.mxu1 %vm323_vm14, %v840_v49  ;;  %3457 = vmatprep.mubr.msk.f32.mxu1 %vm3917_vm7, %v3916_v31  ;;  %v1093_v49 = vrot.slane %v1079_v42, %v1085_v55 }
 0x2db   :  { %3460 = vmatprep.subr.mxu1 %v3916_v31 }
 0x2dc   :  { %v1109_v58 = vrot.slane %v1093_v49, %v1085_v55  ;;  %v1095_v56 = vcombine.high %v1093_v49, %v1093_v49 }
 0x2dd   :  { %3458 = vmatmul.mubr.msk.f32.vlgmr.msra.gmra.mrb[18].mxu1 %vm323_vm14, %v4174_v32 }
 0x2de   :  { %3462 = vmatprep.mubr.msk.f32.mxu1 %vm3917_vm7, %v3916_v31  ;;  %v3170_v61 = vadd.f32 -1.0, %v1109_v58  ;;  %v1123_v62 = vrot.slane %v1095_v56, %v1085_v55 }
 0x2e0   :  { %v1148_v63 = vmul.f32 1e+09, %v3170_v61  ;;  %v1127_v28 = vcombine.high %v1123_v62, %v1123_v62 }
 0x2e2   :  { %v1179_v1 = vrot.slane %v1148_v63, %v4153_v19  ;;  %v3173_v37 = vadd.f32 -1.0, %v1127_v28 }
 0x2e4   :  { %v1151_v40 = vmul.f32 1e+09, %v3173_v37 }
 0x2e6   :  { %v1191_v42 = vrot.slane %v1151_v40, %v4153_v19 }
 0x2e7   :  { %v994_v50 = vpop.permute.xlu1 %993 }
 0x2e8   :  { %3466 = vmatpush3.xpose.msk.msra.mxu0 %vm323_vm14, %v994_v50  ;;  %v917_v51 = vpop.permute.xlu0 %916 }
 0x2e9   :  { %3461 = vmatpush3.xpose.msk.msra.mxu1 %vm323_vm14, %v917_v51  ;;  %3475 = vmatprep.subr.mxu0 %v3916_v31  ;;  %v1175_v51 = vrot.slane %v1147_v45, %v4153_v19 }
 0x2ea   :  { %3470 = vmatprep.subr.mxu1 %v3916_v31 }
 0x2eb   :  { %3468 = vmatmul.mubr.msk.f32.vlgmr.msra.gmra.mrb[8].mxu0 %vm323_vm14, %v4180_v41 }
 0x2ec   :  { %3463 = vmatmul.mubr.msk.f32.vlgmr.msra.gmra.mrb[20].mxu1 %vm323_vm14, %v4182_v43  ;;  %3477 = vmatprep.mubr.msk.f32.mxu0 %vm3917_vm7, %v3916_v31 }
 0x2ed   :  { %3472 = vmatprep.mubr.msk.f32.mxu1 %vm3917_vm7, %v3916_v31 }
 0x389   :  { %v526_v2 = vpop.f32.mrb[8].mxu1 }
 0x38a   :  { %v1069_v3 = vmul.f32 0.17677669, %v526_v2  ;;  %v3434_v4 = vpop.f32.mrb[9].mxu1 }
 0x38c   :  { %v4239_v5 = vadd.f32 %v1163_v0, %v1069_v3  ;;  %v3171_v0 = vadd.f32 -1.0, %v1123_v62 }
 0x38d   :  { %v603_v8 = vpop.f32.mrb[10].mxu1 }
 0x38e   :  { %v1070_v9 = vmul.f32 0.17677669, %v603_v8  ;;  %v3439_v21 = vpop.f32.mrb[11].mxu1  ;;  %v1209_v22 = vsel %vm1208_vm15, %v4239_v5, -inf  ;;  %v1149_v2 = vmul.f32 1e+09, %v3171_v0 }
 0x38f   :  { %1210 = vmax.xlane.f32.xlu0 %v1209_v22 }
 0x390   :  { %v4244_v23 = vadd.f32 %v1167_v6, %v1070_v9  ;;  %v1183_v8 = vrot.slane %v1149_v2, %v4153_v19 }
 0x392   :  { %v1212_v30 = vsel %vm1208_vm15, %v4244_v23, -inf }
 0x393   :  { %1213 = vmax.xlane.f32.xlu1 %v1212_v30 }
 0x399   :  { %v680_v46 = vpop.f32.mrb[12].mxu1 }
 0x39a   :  { %v1071_v47 = vmul.f32 0.17677669, %v680_v46  ;;  %v3444_v48 = vpop.f32.mrb[13].mxu1 }
 0x39c   :  { %v4249_v50 = vadd.f32 %v1171_v44, %v1071_v47 }
 0x39d   :  { %v757_v52 = vpop.f32.mrb[14].mxu1 }
 0x39e   :  { %v1072_v53 = vmul.f32 0.17677669, %v757_v52  ;;  %v3449_v54 = vpop.f32.mrb[15].mxu1  ;;  %v1215_v57 = vsel %vm1208_vm15, %v4249_v50, -inf  ;;  %v1125_v52 = vcombine.high %v1109_v58, %v1109_v58 }
 0x39f   :  { %1216 = vmax.xlane.f32.xlu0 %v1215_v57 }
 0x3a0   :  { %v4254_v59 = vadd.f32 %v1175_v51, %v1072_v53  ;;  %v3172_v53 = vadd.f32 -1.0, %v1125_v52 }
 0x3a2   :  { %v1218_v60 = vsel %vm1208_vm15, %v4254_v59, -inf  ;;  %v1150_v54 = vmul.f32 1e+09, %v3172_v53 }
 0x3a3   :  { %1219 = vmax.xlane.f32.xlu0 %v1218_v60 }
 0x3a4   :  { %v1187_v56 = vrot.slane %v1150_v54, %v4153_v19 }
 0x3ac   :  { %v834_v3 = vpop.f32.mrb[16].mxu1 }
 0x3ad   :  { %v1073_v4 = vmul.f32 0.17677669, %v834_v3  ;;  %v3454_v6 = vpop.f32.mrb[17].mxu1 }
 0x3af   :  { %v1204_v7 = vadd.f32 %v1179_v1, %v1073_v4 }
 0x3b0   :  { %v911_v9 = vpop.f32.mrb[18].mxu1 }
 0x3b1   :  { %v1074_v21 = vmul.f32 0.17677669, %v911_v9  ;;  %v3459_v22 = vpop.f32.mrb[19].mxu1  ;;  %v1221_v26 = vsel %vm1208_vm15, %v1204_v7, -inf }
 0x3b2   :  { %1222 = vmax.xlane.f32.xlu1 %v1221_v26 }
 0x3b3   :  { %v4261_v30 = vadd.f32 %v1183_v8, %v1074_v21 }
 0x3b5   :  { %v1224_v55 = vsel %vm1208_vm15, %v4261_v30, -inf }
 0x3b6   :  { %1225 = vmax.xlane.f32.xlu0 %v1224_v55 }
 0x3be   :  { %v1065_v44 = vpop.f32.mrb[8].mxu0 }
 0x3bf   :  { %v1076_v45 = vmul.f32 0.17677669, %v1065_v44  ;;  %v988_v46 = vpop.f32.mrb[20].mxu1  ;;  %v3469_v47 = vpop.f32.mrb[9].mxu0 }
 0x3c0   :  { %v3464_v48 = vpop.f32.mrb[21].mxu1  ;;  %v1075_v57 = vmul.f32 0.17677669, %v988_v46 }
 0x3c1   :  { %v1207_v49 = vadd.f32 %v1191_v42, %v1076_v45 }
 0x3c2   :  { %v4274_v60 = vadd.f32 %v1187_v56, %v1075_v57 }
 0x3c3   :  { %1297 = vrot.lane.b32.xlu1 %v4162_v24, %s3920_s1  ;;  %v1230_v51 = vsel %vm1208_vm15, %v1207_v49, -inf }
 0x3c4   :  { %1231 = vmax.xlane.f32.xlu0 %v1230_v51  ;;  %v1227_v24 = vsel %vm1208_vm15, %v4274_v60, -inf }
 0x3c7   :  { %1449 = vrot.lane.b32.xlu1 %v4170_v29, %s3920_s1 }
 0x3da   :  { %1373 = vrot.lane.b32.xlu0 %v4165_v25, %s3920_s1 }
 0x3eb   :  { %1228 = vmax.xlane.f32.xlu1 %v1227_v24 }
 0x3fc   :  { %1525 = vrot.lane.b32.xlu1 %v4168_v27, %s3920_s1 }
 0x41c   :  { %v1211_v61 = vpop.xlane.xlu0 %1210 }
 0x41d   :  { %v1233_v29 = vsub.f32 %v4239_v5, %v1211_v61 }
 0x41f   :  { %v1241_v58 = vmul.f32 1.442695, %v1233_v29 }
 0x420   :  { %v1214_v62 = vpop.xlane.xlu1 %1213 }
 0x421   :  { %3799 = vpow2.f32 %v1241_v58  ;;  %v1234_v25 = vsub.f32 %v4244_v23, %v1214_v62 }
 0x423   :  { %v1243_v63 = vmul.f32 1.442695, %v1234_v25 }
 0x425   :  { %3801 = vpow2.f32 %v1243_v63 }
 0x42b   :  { %v4282_v0 = vpop.eup %3799 }
 0x42c   :  { %v1217_v1 = vpop.xlane.xlu0 %1216  ;;  %v1257_v2 = vsel %vm1208_vm15, %v4282_v0, 0.0 }
 0x42d   :  { %v1235_v3 = vsub.f32 %v4249_v50, %v1217_v1  ;;  %1258 = vadd.xlane.f32.xlu1 %v1257_v2 }
 0x42f   :  { %v4287_v27 = vpop.eup %3801  ;;  %v1245_v4 = vmul.f32 1.442695, %v1235_v3 }
 0x430   :  { %v1260_v5 = vsel %vm1208_vm15, %v4287_v27, 0.0  ;;  %v1220_v50 = vpop.xlane.xlu0 %1219 }
 0x431   :  { %3803 = vpow2.f32 %v1245_v4  ;;  %1261 = vadd.xlane.f32.xlu0 %v1260_v5  ;;  %v1236_v37 = vsub.f32 %v4254_v59, %v1220_v50 }
 0x433   :  { %v1247_v44 = vmul.f32 1.442695, %v1236_v37 }
 0x43b   :  { %v4291_v23 = vpop.eup %3803 }
 0x43c   :  { %v1263_v6 = vsel %vm1208_vm15, %v4291_v23, 0.0 }
 0x43d   :  { %1264 = vadd.xlane.f32.xlu1 %v1263_v6 }
 0x43f   :  { %v1223_v8 = vpop.xlane.xlu1 %1222 }
 0x440   :  { %v1237_v9 = vsub.f32 %v1204_v7, %v1223_v8 }
 0x442   :  { %v1249_v21 = vmul.f32 1.442695, %v1237_v9 }
 0x443   :  { %v1298_v22 = vpop.permute.xlu1 %1297  ;;  %v1226_v26 = vpop.xlane.xlu0 %1225 }
 0x444   :  { %3805 = vpow2.f32 %v1249_v21  ;;  %3471 = vmatpush3.msra.mxu1 %v1298_v22  ;;  %v1238_v7 = vsub.f32 %v4261_v30, %v1226_v26 }
 0x445   :  { %3480 = vmatprep.subr.mxu1 %v3916_v31 }
 0x446   :  { %v1251_v47 = vmul.f32 1.442695, %v1238_v7 }
 0x447   :  { %v1450_v53 = vpop.permute.xlu1 %1449 }
 0x44e   :  { %v4296_v28 = vpop.eup %3805 }
 0x44f   :  { %v1269_v55 = vsel %vm1208_vm15, %v4296_v28, 0.0 }
 0x450   :  { %1270 = vadd.xlane.f32.xlu1 %v1269_v55 }
 0x451   :  { %v1232_v40 = vpop.xlane.xlu0 %1231 }
 0x452   :  { %v1240_v42 = vsub.f32 %v1207_v49, %v1232_v40 }
 0x454   :  { %v1255_v45 = vmul.f32 1.442695, %v1240_v42 }
 0x455   :  { %v1374_v46 = vpop.permute.xlu0 %1373 }
 0x456   :  { %3807 = vpow2.f32 %v1255_v45  ;;  %3476 = vmatpush3.msra.mxu0 %v1374_v46 }
 0x457   :  { %3485 = vmatprep.subr.mxu0 %v3916_v31  ;;  %3809 = vpow2.f32 %v1247_v44 }
 0x458   :  { %3811 = vpow2.f32 %v1251_v47 }
 0x460   :  { %v4303_v48 = vpop.eup %3807 }
 0x461   :  { %1677 = vrot.lane.b32.xlu1 %v4174_v32, %s3920_s1  ;;  %v1278_v59 = vsel %vm1208_vm15, %v4303_v48, 0.0  ;;  %v3810_v49 = vpop.eup %3809 }
 0x462   :  { %1279 = vadd.xlane.f32.xlu0 %v1278_v59  ;;  %v1266_v30 = vsel %vm1208_vm15, %v3810_v49, 0.0  ;;  %v4310_v51 = vpop.eup %3811 }
 0x463   :  { %v1272_v52 = vsel %vm1208_vm15, %v4310_v51, 0.0 }
 0x466   :  { %1267 = vadd.xlane.f32.xlu0 %v1266_v30 }
 0x46a   :  { %1273 = vadd.xlane.f32.xlu0 %v1272_v52 }
 0x478   :  { %v1229_v54 = vpop.xlane.xlu1 %1228 }
 0x479   :  { %v1239_v57 = vsub.f32 %v4274_v60, %v1229_v54 }
 0x47b   :  { %v1253_v56 = vmul.f32 1.442695, %v1239_v57 }
 0x47d   :  { %3813 = vpow2.f32 %v1253_v56 }
 0x480   :  { %1601 = vrot.lane.b32.xlu0 %v4176_v39, %s3920_s1  ;;  %v3772_v39 = vpack.i.bf16 %v4065_v38, %v4056_v35 }
 0x484   :  { %1753 = vrot.lane.b32.xlu0 %v4182_v43, %s3920_s1  ;;  %v1526_v43 = vpop.permute.xlu1 %1525 }
 0x487   :  { %v4319_v32 = vpop.eup %3813 }
 0x488   :  { %v1275_v24 = vsel %vm1208_vm15, %v4319_v32, 0.0  ;;  %3768 = vrot.lane.b32.xlu0 %v3767_v36, %s3921_s28 }
 0x489   :  { %1276 = vadd.xlane.f32.xlu1 %v1275_v24 }
 0x49a   :  { %1829 = vrot.lane.b32.xlu1 %v4180_v41, %s3920_s1 }
 0x49e   :  { %3773 = vrot.lane.b32.xlu1 %v3772_v39, %s3921_s28 }
 0x4ba   :  { %v1259_v60 = vpop.xlane.xlu1 %1258 }
 0x4bb   :  { %3815 = vrcp.f32 %v1259_v60  ;;  %v1907_v60 = vsub.s32 1, %v4146_v18 }
 0x4be   :  { %v1262_v61 = vpop.xlane.xlu0 %1261 }
 0x4bf   :  { %3817 = vrcp.f32 %v1262_v61  ;;  %v1908_v61 = vrot.slane %v4158_v20, %v1907_v60 }
 0x4c5   :  { %v3816_v29 = vpop.eup %3815 }
 0x4c6   :  { %v1289_v58 = vmul.f32 %v3816_v29, %v4282_v0 }
 0x4c8   :  { %3473 = vmatmul.mubr.msk.f32.vlgmr.msra.gmra.mrb[22].mxu1 %vm1208_vm15, %v1289_v58 }
 0x4c9   :  { %v3818_v41 = vpop.eup %3817  ;;  %3481 = vmatpush3.msra.mxu1 %v1450_v53  ;;  %3482 = vmatprep.mubr.msk.f32.mxu1 %vm3917_vm7, %v3916_v31 }
 0x4ca   :  { %v1290_v33 = vmul.f32 %v3818_v41, %v4287_v27  ;;  %v1265_v34 = vpop.xlane.xlu1 %1264  ;;  %3490 = vmatprep.subr.mxu1 %v3916_v31 }
 0x4cb   :  { %3819 = vrcp.f32 %v1265_v34 }
 0x4cc   :  { %3478 = vmatmul.mubr.msk.f32.vlgmr.msra.gmra.mrb[10].mxu0 %vm1208_vm15, %v1290_v33 }
 0x4cd   :  { %3486 = vmatpush3.msra.mxu0 %v1526_v43  ;;  %3487 = vmatprep.mubr.msk.f32.mxu0 %vm3917_vm7, %v3916_v31 }
 0x4ce   :  { %3495 = vmatprep.subr.mxu0 %v3916_v31 }
 0x4d5   :  { %v3820_v35 = vpop.eup %3819 }
 0x4d6   :  { %v1291_v36 = vmul.f32 %v3820_v35, %v4291_v23 }
 0x4d8   :  { %3483 = vmatmul.mubr.msk.f32.vlgmr.msra.gmra.mrb[24].mxu1 %vm1208_vm15, %v1291_v36 }
 0x4d9   :  { %3492 = vmatprep.mubr.msk.f32.mxu1 %vm3917_vm7, %v3916_v31 }
 0x4dd   :  { %v1271_v38 = vpop.xlane.xlu1 %1270 }
 0x4de   :  { %3821 = vrcp.f32 %v1271_v38 }
 0x4e1   :  { %v1678_v5 = vpop.permute.xlu1 %1677 }
 0x4e8   :  { %v3822_v0 = vpop.eup %3821 }
 0x4e9   :  { %v1293_v1 = vmul.f32 %v3822_v0, %v4296_v28  ;;  %v4399_v0 = vld [vmem:[%s4752_s3 + $0x18] sm:$0xff] }
 0x4ef   :  { %v1280_v62 = vpop.xlane.xlu0 %1279 }
 0x4f3   :  { %v1268_v25 = vpop.xlane.xlu0 %1267 }
 0x4f4   :  { %3823 = vrcp.f32 %v1268_v25 }
 0x4f7   :  { %v1274_v63 = vpop.xlane.xlu0 %1273 }
 0x4f8   :  { %3825 = vrcp.f32 %v1274_v63  ;;  %v4394_v63 = vld [vmem:[%s4752_s3 + $0x8] sm:$0xff] }
 0x4f9   :  { %3827 = vrcp.f32 %v1280_v62 }
 0x4fb   :  { %v1602_v2 = vpop.permute.xlu0 %1601 }
 0x4fc   :  { %3491 = vmatpush3.msra.mxu1 %v1602_v2  ;;  %v4406_v2 = vld [vmem:[%s4752_s3 + $0x28] sm:$0xff] }
 0x4fd   :  { %3493 = vmatmul.mubr.msk.f32.vlgmr.msra.gmra.mrb[26].mxu1 %vm1208_vm15, %v1293_v1  ;;  %3500 = vmatprep.subr.mxu1 %v3916_v31  ;;  %v3683_v1 = vpack.c.bf16 %v4399_v0, %v4394_v63 }
 0x4fe   :  { %v3824_v3 = vpop.eup %3823  ;;  %3502 = vmatprep.mubr.msk.f32.mxu1 %vm3917_vm7, %v3916_v31 }
 0x4ff   :  { %v1292_v27 = vmul.f32 %v3824_v3, %v3810_v49  ;;  %v1754_v4 = vpop.permute.xlu0 %1753  ;;  %v4411_v3 = vld [vmem:[%s4752_s3 + $0x38] sm:$0xff] }
 0x500   :  { %3501 = vmatpush3.msra.mxu1 %v1754_v4 }
 0x501   :  { %3488 = vmatmul.mubr.msk.f32.vlgmr.msra.gmra.mrb[12].mxu0 %vm1208_vm15, %v1292_v27  ;;  %v3687_v27 = vpack.c.bf16 %v4411_v3, %v4406_v2 }
 0x502   :  { %v3826_v23 = vpop.eup %3825  ;;  %3496 = vmatpush3.msra.mxu0 %v1678_v5  ;;  %3497 = vmatprep.mubr.msk.f32.mxu0 %vm3917_vm7, %v3916_v31 }
 0x503   :  { %v1294_v6 = vmul.f32 %v3826_v23, %v4310_v51  ;;  %3505 = vmatprep.subr.mxu0 %v3916_v31  ;;  %v3769_v8 = vpop.permute.xlu0 %3768  ;;  %v3828_v50 = vpop.eup %3827 }
 0x504   :  { %v3771_v9 = vunpack.i.h.bf16 %v3769_v8  ;;  %v3770_v21 = vunpack.i.l.bf16 %v3769_v8  ;;  %v1296_v28 = vmul.f32 %v3828_v50, %v4303_v48 }
 0x505   :  { %3498 = vmatmul.mubr.msk.f32.vlgmr.msra.gmra.mrb[14].mxu0 %vm1208_vm15, %v1294_v6 }
 0x506   :  { %3507 = vmatprep.mubr.msk.f32.mxu0 %vm3917_vm7, %v3916_v31  ;;  %v3675_v26 = vpack.c.bf16 %v3771_v9, %v3770_v21 }
 0x508   :  { %3676 = vmatprep.subr.bf16.mxu1 %v3675_v26 }
 0x516   :  { %v1277_v22 = vpop.xlane.xlu1 %1276 }
 0x517   :  { %3829 = vrcp.f32 %v1277_v22 }
 0x51a   :  { %v1830_v55 = vpop.permute.xlu1 %1829 }
 0x51b   :  { %3506 = vmatpush3.msra.mxu0 %v1830_v55 }
 0x51c   :  { %3508 = vmatmul.mubr.msk.f32.vlgmr.msra.gmra.mrb[16].mxu0 %vm1208_vm15, %v1296_v28  ;;  %3684 = vmatprep.subr.bf16.mxu0 %v3683_v1 }
 0x51d   :  { %3686 = vmatpush3.bf16.msra.mxu0 %v3683_v1  ;;  %v2197_v1 = vsub.s32 5, %v4146_v18 }
 0x51e   :  { %v3774_v37 = vpop.permute.xlu1 %3773  ;;  %3688 = vmatprep.subr.bf16.mxu0 %v3687_v27 }
 0x51f   :  { %v3776_v40 = vunpack.i.h.bf16 %v3774_v37  ;;  %v3775_v42 = vunpack.i.l.bf16 %v3774_v37 }
 0x521   :  { %v3830_v44 = vpop.eup %3829  ;;  %v3679_v45 = vpack.c.bf16 %v3776_v40, %v3775_v42  ;;  %3690 = vmatpush3.bf16.msra.mxu0 %v3687_v27 }
 0x522   :  { %v1295_v7 = vmul.f32 %v3830_v44, %v4319_v32 }
 0x524   :  { %3503 = vmatmul.mubr.msk.f32.vlgmr.msra.gmra.mrb[28].mxu1 %vm1208_vm15, %v1295_v7 }
 0x525   :  { %3678 = vmatpush3.bf16.msra.mxu1 %v3675_v26 }
 0x526   :  { %3680 = vmatprep.subr.bf16.mxu1 %v3679_v45 }
 0x529   :  { %3682 = vmatpush3.bf16.msra.mxu1 %v3679_v45 }
 0x59b   :  { %v1369_v46 = vpop.f32.mrb[22].mxu1 }
 0x59c   :  { %v3474_v47 = vpop.f32.mrb[23].mxu1  ;;  %3518 = vmatprep.mubr.msk.f32.mxu1 %vm323_vm14, %v1369_v46 }
 0x59f   :  { %v1445_v48 = vpop.f32.mrb[10].mxu0 }
 0x5a0   :  { %v3479_v59 = vpop.f32.mrb[11].mxu0  ;;  %3519 = vmatmul.mubr.msk.f32.vlgmr.msra.gmra.mrb[30].mxu1 %vm323_vm14, %v1445_v48 }
 0x5ab   :  { %v1521_v49 = vpop.f32.mrb[24].mxu1 }
 0x5ac   :  { %v3484_v30 = vpop.f32.mrb[25].mxu1  ;;  %3521 = vmatprep.mubr.msk.f32.mxu1 %vm323_vm14, %v1521_v49 }
 0x5d0   :  { %v1673_v51 = vpop.f32.mrb[26].mxu1 }
 0x5d1   :  { %v3494_v52 = vpop.f32.mrb[27].mxu1 }
 0x5d4   :  { %v1597_v53 = vpop.f32.mrb[12].mxu0 }
 0x5d5   :  { %v3489_v54 = vpop.f32.mrb[13].mxu0  ;;  %3522 = vmatmul.mubr.msk.f32.gmra.mrb[32].mxu1 %vm323_vm14, %v1597_v53 }
 0x5d6   :  { %3524 = vmatprep.mubr.msk.f32.mxu1 %vm323_vm14, %v1673_v51 }
 0x5d8   :  { %v1749_v57 = vpop.f32.mrb[14].mxu0 }
 0x5d9   :  { %v3499_v56 = vpop.f32.mrb[15].mxu0  ;;  %3525 = vmatmul.mubr.msk.f32.gmra.mrb[34].mxu1 %vm323_vm14, %v1749_v57 }
 0x5ef   :  { %v1901_v32 = vpop.f32.mrb[16].mxu0 }
 0x5f0   :  { %v3509_v24 = vpop.f32.mrb[17].mxu0 }
 0x5f7   :  { %v1825_v39 = vpop.f32.mrb[28].mxu1 }
 0x5f8   :  { %v3504_v43 = vpop.f32.mrb[29].mxu1  ;;  %3527 = vmatprep.mubr.msk.f32.mxu1 %vm323_vm14, %v1825_v39 }
 0x5f9   :  { %3528 = vmatmul.mubr.msk.f32.gmra.mrb[36].mxu1 %vm323_vm14, %v1901_v32 }
 0x673   :  { %v3520_v29 = vpop.f32.mrb[30].mxu1 }
 0x674   :  { %v2021_v58 = vadd.f32 %v3520_v29, %v1908_v61  ;;  %v2015_v41 = vpop.f32.mrb[31].mxu1 }
 0x675   :  { %v2016_v33 = vadd.f32 %v2015_v41, %v1908_v61 }
 0x676   :  { %v4376_v34 = vadd.f32 %v4113_v10, %v2021_v58 }
 0x677   :  { %v4379_v35 = vadd.f32 %v2016_v33, %v4115_v11 }
 0x678   :  { %v2065_v36 = vsel %vm323_vm14, %v4376_v34, 0.0  ;;  %v2096_v10 = vmul.f32 %v4376_v34, %v4376_v34 }
 0x679   :  { %2066 = vadd.xlane.f32.xlu1 %v2065_v36  ;;  %v2062_v38 = vsel %vm323_vm14, %v4379_v35, 0.0  ;;  %v2095_v62 = vmul.f32 %v4379_v35, %v4379_v35 }
 0x67a   :  { %2063 = vadd.xlane.f32.xlu0 %v2062_v38  ;;  %v2106_v11 = vsel %vm323_vm14, %v2096_v10, 0.0 }
 0x67b   :  { %v2103_v25 = vsel %vm323_vm14, %v2095_v62, 0.0 }
 0x67e   :  { %2104 = vadd.xlane.f32.xlu0 %v2103_v25 }
 0x682   :  { %2107 = vadd.xlane.f32.xlu0 %v2106_v11  ;;  %v2185_v11 = vsub.s32 4, %v4146_v18 }
 0x6a8   :  { %v3523_v4 = vpop.f32.mrb[32].mxu1 }
 0x6a9   :  { %v2031_v5 = vadd.f32 %v3523_v4, %v1908_v61  ;;  %v2025_v23 = vpop.f32.mrb[33].mxu1  ;;  %v4467_v4 = vrot.slane %v4158_v20, %v2185_v11 }
 0x6aa   :  { %v2026_v6 = vadd.f32 %v2025_v23, %v1908_v61 }
 0x6ab   :  { %v4416_v8 = vadd.f32 %v4121_v12, %v2031_v5 }
 0x6ac   :  { %v4419_v9 = vadd.f32 %v2026_v6, %v4123_v13  ;;  %v3526_v21 = vpop.f32.mrb[34].mxu1  ;;  %v4470_v6 = vrot.slane %v4158_v20, %v2197_v1 }
 0x6ad   :  { %v2041_v22 = vadd.f32 %v3526_v21, %v1908_v61  ;;  %v2035_v50 = vpop.f32.mrb[35].mxu1  ;;  %v2071_v26 = vsel %vm323_vm14, %v4416_v8, 0.0  ;;  %v2098_v28 = vmul.f32 %v4416_v8, %v4416_v8 }
 0x6ae   :  { %v2036_v55 = vadd.f32 %v2035_v50, %v1908_v61  ;;  %2072 = vadd.xlane.f32.xlu0 %v2071_v26  ;;  %v2068_v37 = vsel %vm323_vm14, %v4419_v9, 0.0  ;;  %v2097_v12 = vmul.f32 %v4419_v9, %v4419_v9 }
 0x6af   :  { %v4430_v13 = vadd.f32 %v4129_v14, %v2041_v22  ;;  %2069 = vadd.xlane.f32.xlu1 %v2068_v37  ;;  %v2112_v42 = vsel %vm323_vm14, %v2098_v28, 0.0 }
 0x6b0   :  { %v4433_v40 = vadd.f32 %v2036_v55, %v4131_v15  ;;  %v2109_v44 = vsel %vm323_vm14, %v2097_v12, 0.0 }
 0x6b1   :  { %v2077_v7 = vsel %vm323_vm14, %v4430_v13, 0.0  ;;  %v2100_v45 = vmul.f32 %v4430_v13, %v4430_v13 }
 0x6b2   :  { %2113 = vadd.xlane.f32.xlu0 %v2112_v42  ;;  %v2074_v14 = vsel %vm323_vm14, %v4433_v40, 0.0  ;;  %v2099_v15 = vmul.f32 %v4433_v40, %v4433_v40 }
 0x6b3   :  { %2110 = vadd.xlane.f32.xlu1 %v2109_v44  ;;  %v2118_v46 = vsel %vm323_vm14, %v2100_v45, 0.0 }
 0x6b4   :  { %v2115_v47 = vsel %vm323_vm14, %v2099_v15, 0.0 }
 0x6b6   :  { %2078 = vadd.xlane.f32.xlu0 %v2077_v7 }
 0x6b7   :  { %2075 = vadd.xlane.f32.xlu1 %v2074_v14 }
 0x6ba   :  { %2119 = vadd.xlane.f32.xlu0 %v2118_v46 }
 0x6bb   :  { %2116 = vadd.xlane.f32.xlu1 %v2115_v47 }
 0x6cc   :  { %v3529_v48 = vpop.f32.mrb[36].mxu1 }
 0x6cd   :  { %v2051_v59 = vadd.f32 %v3529_v48, %v1908_v61  ;;  %v2045_v49 = vpop.f32.mrb[37].mxu1 }
 0x6ce   :  { %v2046_v30 = vadd.f32 %v2045_v49, %v1908_v61 }
 0x6cf   :  { %v4448_v51 = vadd.f32 %v4137_v16, %v2051_v59 }
 0x6d0   :  { %v4451_v52 = vadd.f32 %v2046_v30, %v4139_v17 }
 0x6d1   :  { %v2083_v53 = vsel %vm323_vm14, %v4448_v51, 0.0  ;;  %v2102_v54 = vmul.f32 %v4448_v51, %v4448_v51 }
 0x6d2   :  { %2084 = vadd.xlane.f32.xlu0 %v2083_v53  ;;  %v2080_v57 = vsel %vm323_vm14, %v4451_v52, 0.0  ;;  %v2101_v56 = vmul.f32 %v4451_v52, %v4451_v52 }
 0x6d3   :  { %2081 = vadd.xlane.f32.xlu1 %v2080_v57  ;;  %v2124_v16 = vsel %vm323_vm14, %v2102_v54, 0.0 }
 0x6d4   :  { %v2121_v17 = vsel %vm323_vm14, %v2101_v56, 0.0 }
 0x6d6   :  { %2125 = vadd.xlane.f32.xlu0 %v2124_v16 }
 0x6d7   :  { %2122 = vadd.xlane.f32.xlu1 %v2121_v17 }
 0x706   :  { %v2067_v39 = vpop.xlane.xlu1 %2066 }
 0x707   :  { %v2064_v32 = vpop.xlane.xlu0 %2063  ;;  %v2088_v61 = vmul.f32 0.03125, %v2067_v39 }
 0x708   :  { %v2087_v24 = vmul.f32 0.03125, %v2064_v32 }
 0x709   :  { %v2136_v36 = vmul.f32 %v2088_v61, %v2088_v61  ;;  %v2152_v21 = vsub.f32 %v4376_v34, %v2088_v61 }
 0x70a   :  { %v2135_v29 = vmul.f32 %v2087_v24, %v2087_v24  ;;  %v2151_v27 = vsub.f32 %v4379_v35, %v2087_v24 }
 0x70b   :  { %v2105_v43 = vpop.xlane.xlu0 %2104 }
 0x70c   :  { %v2127_v58 = vmul.f32 0.03125, %v2105_v43 }
 0x70e   :  { %v2143_v41 = vsub.f32 %v2127_v58, %v2135_v29 }
 0x70f   :  { %v2108_v33 = vpop.xlane.xlu0 %2107 }
 0x710   :  { %v2159_v38 = vadd.f32 1e-12, %v2143_v41  ;;  %v2128_v62 = vmul.f32 0.03125, %v2108_v33 }
 0x712   :  { %3831 = vrsqrt.f32 %v2159_v38  ;;  %v2144_v25 = vsub.f32 %v2128_v62, %v2136_v36 }
 0x714   :  { %v2160_v10 = vadd.f32 1e-12, %v2144_v25 }
 0x716   :  { %3833 = vrsqrt.f32 %v2160_v10 }
 0x71c   :  { %v3832_v5 = vpop.eup %3831 }
 0x71d   :  { %v2175_v23 = vmul.f32 %v3832_v5, %v2151_v27 }
 0x71f   :  { %v2187_v22 = vmul.f32 %v4467_v4, %v2175_v23 }
 0x720   :  { %v3834_v50 = vpop.eup %3833 }
 0x721   :  { %v2176_v26 = vmul.f32 %v3834_v50, %v2152_v21  ;;  %v4475_v28 = vadd.f32 %v4470_v6, %v2187_v22 }
 0x723   :  { %3538 = vmatprep.mubr.msk.f32.mxu0 %vm323_vm14, %v4475_v28  ;;  %v2188_v35 = vmul.f32 %v4467_v4, %v2176_v26 }
 0x725   :  { %v4481_v55 = vadd.f32 %v4470_v6, %v2188_v35 }
 0x727   :  { %3539 = vmatmul.mubr.msk.f32.vlgmr.msra.gmra.mrb[18].mxu0 %vm323_vm14, %v4481_v55 }
 0x73b   :  { %v2073_v20 = vpop.xlane.xlu0 %2072 }
 0x73c   :  { %v2090_v34 = vmul.f32 0.03125, %v2073_v20  ;;  %v2070_v37 = vpop.xlane.xlu1 %2069 }
 0x73d   :  { %v2089_v12 = vmul.f32 0.03125, %v2070_v37 }
 0x73e   :  { %v2138_v44 = vmul.f32 %v2090_v34, %v2090_v34  ;;  %v2154_v58 = vsub.f32 %v4416_v8, %v2090_v34 }
 0x73f   :  { %v2114_v42 = vpop.xlane.xlu0 %2113  ;;  %v2137_v14 = vmul.f32 %v2089_v12, %v2089_v12  ;;  %v2153_v33 = vsub.f32 %v4419_v9, %v2089_v12 }
 0x740   :  { %v2130_v7 = vmul.f32 0.03125, %v2114_v42  ;;  %v2111_v45 = vpop.xlane.xlu1 %2110 }
 0x741   :  { %v2129_v15 = vmul.f32 0.03125, %v2111_v45 }
 0x742   :  { %v2146_v46 = vsub.f32 %v2130_v7, %v2138_v44 }
 0x743   :  { %v2145_v47 = vsub.f32 %v2129_v15, %v2137_v14  ;;  %v2079_v48 = vpop.xlane.xlu0 %2078 }
 0x744   :  { %v2162_v59 = vadd.f32 1e-12, %v2146_v46  ;;  %v2092_v49 = vmul.f32 0.03125, %v2079_v48  ;;  %v2076_v30 = vpop.xlane.xlu1 %2075 }
 0x745   :  { %v2161_v53 = vadd.f32 1e-12, %v2145_v47  ;;  %v2091_v54 = vmul.f32 0.03125, %v2076_v30 }
 0x746   :  { %3835 = vrsqrt.f32 %v2162_v59  ;;  %v2140_v56 = vmul.f32 %v2092_v49, %v2092_v49  ;;  %v2156_v1 = vsub.f32 %v4430_v13, %v2092_v49 }
 0x747   :  { %3837 = vrsqrt.f32 %v2161_v53  ;;  %v2120_v57 = vpop.xlane.xlu0 %2119  ;;  %v2139_v32 = vmul.f32 %v2091_v54, %v2091_v54  ;;  %v2155_v5 = vsub.f32 %v4433_v40, %v2091_v54 }
 0x748   :  { %v2132_v16 = vmul.f32 0.03125, %v2120_v57  ;;  %v2117_v17 = vpop.xlane.xlu1 %2116 }
 0x749   :  { %v2131_v24 = vmul.f32 0.03125, %v2117_v17 }
 0x74a   :  { %v2148_v39 = vsub.f32 %v2132_v16, %v2140_v56 }
 0x74b   :  { %v2147_v43 = vsub.f32 %v2131_v24, %v2139_v32  ;;  %v2415_v32 = vld [vmem:[%s4755_s4 + $0x18] sm:$0xff] }
 0x74c   :  { %v2164_v61 = vadd.f32 1e-12, %v2148_v39  ;;  %v2416_v39 = vld [vmem:[%s4755_s4 + $0x20] sm:$0xff] }
 0x74d   :  { %v2163_v29 = vadd.f32 1e-12, %v2147_v43  ;;  %v2417_v43 = vld [vmem:[%s4755_s4 + $0x28] sm:$0xff] }
 0x74e   :  { %3839 = vrsqrt.f32 %v2164_v61  ;;  %v3699_v61 = vpack.c.bf16 %v2417_v43, %v2416_v39 }
 0x74f   :  { %3841 = vrsqrt.f32 %v2163_v29  ;;  %v2418_v29 = vld [vmem:[%s4755_s4 + $0x30] sm:$0xff] }
 0x750   :  { %v3836_v41 = vpop.eup %3835 }
 0x751   :  { %v3838_v36 = vpop.eup %3837  ;;  %v2178_v38 = vmul.f32 %v3836_v41, %v2154_v58  ;;  %v2419_v58 = vld [vmem:[%s4755_s4 + $0x38] sm:$0xff] }
 0x752   :  { %v2177_v62 = vmul.f32 %v3838_v36, %v2153_v33  ;;  %v3703_v41 = vpack.c.bf16 %v2419_v58, %v2418_v29  ;;  %v2209_v33 = vsub.s32 2, %v4146_v18  ;;  %v4555_v36 = vld [vmem:[%s4753_s5] sm:$0xff] }
 0x753   :  { %v2190_v25 = vmul.f32 %v4467_v4, %v2178_v38 }
 0x754   :  { %v2189_v10 = vmul.f32 %v4467_v4, %v2177_v62  ;;  %v4558_v38 = vrot.slane %v4555_v36, %v2209_v33 }
 0x755   :  { %v4494_v27 = vadd.f32 %v4470_v6, %v2190_v25 }
 0x756   :  { %v4490_v11 = vadd.f32 %v4470_v6, %v2189_v10 }
 0x758   :  { %v3840_v8 = vpop.eup %3839  ;;  %3541 = vmatprep.mubr.msk.f32.mxu0 %vm323_vm14, %v4490_v11 }
 0x759   :  { %v3842_v9 = vpop.eup %3841  ;;  %3542 = vmatmul.mubr.msk.f32.gmra.mrb[20].mxu0 %vm323_vm14, %v4494_v27  ;;  %v2180_v23 = vmul.f32 %v3840_v8, %v2156_v1 }
 0x75a   :  { %v2179_v21 = vmul.f32 %v3842_v9, %v2155_v5 }
 0x75b   :  { %v2192_v22 = vmul.f32 %v4467_v4, %v2180_v23 }
 0x75c   :  { %v2191_v50 = vmul.f32 %v4467_v4, %v2179_v21 }
 0x75d   :  { %v4507_v35 = vadd.f32 %v4470_v6, %v2192_v22 }
 0x75e   :  { %v4504_v13 = vadd.f32 %v4470_v6, %v2191_v50 }
 0x75f   :  { %v2085_v26 = vpop.xlane.xlu0 %2084 }
 0x760   :  { %v2094_v40 = vmul.f32 0.03125, %v2085_v26  ;;  %v2082_v20 = vpop.xlane.xlu1 %2081  ;;  %3544 = vmatprep.mubr.msk.f32.mxu0 %vm323_vm14, %v4504_v13 }
 0x761   :  { %v2093_v34 = vmul.f32 0.03125, %v2082_v20  ;;  %3545 = vmatmul.mubr.msk.f32.gmra.mrb[22].mxu0 %vm323_vm14, %v4507_v35 }
 0x762   :  { %v2142_v12 = vmul.f32 %v2094_v40, %v2094_v40  ;;  %v2158_v48 = vsub.f32 %v4448_v51, %v2094_v40  ;;  %v2412_v51 = vld [vmem:[%s4755_s4] sm:$0xff] }
 0x763   :  { %v2126_v37 = vpop.xlane.xlu0 %2125  ;;  %v2141_v7 = vmul.f32 %v2093_v34, %v2093_v34  ;;  %v2157_v49 = vsub.f32 %v4451_v52, %v2093_v34  ;;  %v2413_v52 = vld [vmem:[%s4755_s4 + $0x8] sm:$0xff] }
 0x764   :  { %v2134_v42 = vmul.f32 0.03125, %v2126_v37  ;;  %v2123_v44 = vpop.xlane.xlu1 %2122 }
 0x765   :  { %v2133_v45 = vmul.f32 0.03125, %v2123_v44 }
 0x766   :  { %v2150_v14 = vsub.f32 %v2134_v42, %v2142_v12 }
 0x767   :  { %v2149_v15 = vsub.f32 %v2133_v45, %v2141_v7 }
 0x768   :  { %v2166_v46 = vadd.f32 1e-12, %v2150_v14 }
 0x769   :  { %v2165_v47 = vadd.f32 1e-12, %v2149_v15 }
 0x76a   :  { %3843 = vrsqrt.f32 %v2166_v46 }
 0x76b   :  { %3845 = vrsqrt.f32 %v2165_v47 }
 0x774   :  { %v3844_v59 = vpop.eup %3843 }
 0x775   :  { %v3846_v30 = vpop.eup %3845  ;;  %v2182_v53 = vmul.f32 %v3844_v59, %v2158_v48 }
 0x776   :  { %v2181_v54 = vmul.f32 %v3846_v30, %v2157_v49 }
 0x777   :  { %v2194_v57 = vmul.f32 %v4467_v4, %v2182_v53 }
 0x778   :  { %v2193_v56 = vmul.f32 %v4467_v4, %v2181_v54  ;;  %v3691_v4 = vpack.c.bf16 %v2413_v52, %v2412_v51 }
 0x779   :  { %v4521_v17 = vadd.f32 %v4470_v6, %v2194_v57 }
 0x77a   :  { %v4518_v16 = vadd.f32 %v4470_v6, %v2193_v56  ;;  %3692 = vmatprep.subr.bf16.mxu1 %v3691_v4  ;;  %v2414_v6 = vld [vmem:[%s4755_s4 + $0x10] sm:$0xff] }
 0x77b   :  { %3694 = vmatpush3.bf16.msra.mxu1 %v3691_v4  ;;  %v3695_v24 = vpack.c.bf16 %v2415_v32, %v2414_v6 }
 0x77c   :  { %3547 = vmatprep.mubr.msk.f32.mxu0 %vm323_vm14, %v4518_v16 }
 0x77d   :  { %3548 = vmatmul.mubr.msk.f32.gmra.mrb[24].mxu0 %vm323_vm14, %v4521_v17  ;;  %3696 = vmatprep.subr.bf16.mxu1 %v3695_v24 }
 0x77f   :  { %3698 = vmatpush3.bf16.msra.mxu1 %v3695_v24 }
 0x780   :  { %3700 = vmatprep.subr.bf16.mxu1 %v3699_v61 }
 0x783   :  { %3702 = vmatpush3.bf16.msra.mxu1 %v3699_v61 }
 0x784   :  { %3704 = vmatprep.subr.bf16.mxu1 %v3703_v41 }
 0x787   :  { %3706 = vmatpush3.bf16.msra.mxu1 %v3703_v41 }
 0x7fa   :  { %v3540_v62 = vpop.f32.mrb[18].mxu0 }
 0x7fb   :  { %v2307_v25 = vadd.f32 %v3540_v62, %v4558_v38  ;;  %v2301_v10 = vpop.f32.mrb[19].mxu0 }
 0x7fc   :  { %v2302_v1 = vadd.f32 %v2301_v10, %v4558_v38 }
 0x7fd   :  { %v2341_v8 = vmul.f32 %v2307_v25, %v2307_v25 }
 0x7fe   :  { %v2340_v5 = vmul.f32 %v2302_v1, %v2302_v1 }
 0x7ff   :  { %v2349_v9 = vmul.f32 %v2341_v8, %v2307_v25 }
 0x800   :  { %v2348_v23 = vmul.f32 %v2340_v5, %v2302_v1 }
 0x801   :  { %v2357_v21 = vmul.f32 0.044715, %v2349_v9 }
 0x802   :  { %v2356_v22 = vmul.f32 0.044715, %v2348_v23 }
 0x803   :  { %v2365_v50 = vadd.f32 %v2357_v21, %v2307_v25 }
 0x804   :  { %v2364_v26 = vadd.f32 %v2356_v22, %v2302_v1 }
 0x805   :  { %v2373_v40 = vmul.f32 0.7978846, %v2365_v50 }
 0x806   :  { %v2372_v20 = vmul.f32 0.7978846, %v2364_v26 }
 0x807   :  { %3847 = vtanh.f32 %v2373_v40 }
 0x808   :  { %3849 = vtanh.f32 %v2372_v20 }
 0x811   :  { %v3848_v34 = vpop.eup %3847 }
 0x812   :  { %v3850_v37 = vpop.eup %3849  ;;  %v2389_v12 = vadd.f32 1.0, %v3848_v34 }
 0x813   :  { %v2388_v42 = vadd.f32 1.0, %v3850_v37 }
 0x814   :  { %v2397_v44 = vmul.f32 0.5, %v2389_v12 }
 0x815   :  { %v2396_v7 = vmul.f32 0.5, %v2388_v42 }
 0x816   :  { %v2405_v14 = vmul.f32 %v2397_v44, %v2307_v25 }
 0x817   :  { %v2404_v45 = vmul.f32 %v2396_v7, %v2302_v1 }
 0x819   :  { %3566 = vmatprep.mubr.msk.f32.mxu1 %vm2424_vm0, %v2404_v45 }
 0x81a   :  { %3567 = vmatmul.mubr.msk.f32.vlgmr.msra.gmra.mrb[38].mxu1 %vm2424_vm0, %v2405_v14 }
 0x82c   :  { %v3543_v15 = vpop.f32.mrb[20].mxu0 }
 0x82d   :  { %v2317_v46 = vadd.f32 %v3543_v15, %v4558_v38  ;;  %v2311_v47 = vpop.f32.mrb[21].mxu0 }
 0x82e   :  { %v2312_v48 = vadd.f32 %v2311_v47, %v4558_v38 }
 0x82f   :  { %v2343_v59 = vmul.f32 %v2317_v46, %v2317_v46 }
 0x830   :  { %v2342_v49 = vmul.f32 %v2312_v48, %v2312_v48 }
 0x831   :  { %v2351_v30 = vmul.f32 %v2343_v59, %v2317_v46 }
 0x832   :  { %v2350_v53 = vmul.f32 %v2342_v49, %v2312_v48 }
 0x833   :  { %v2359_v54 = vmul.f32 0.044715, %v2351_v30 }
 0x834   :  { %v2358_v57 = vmul.f32 0.044715, %v2350_v53  ;;  %v3546_v56 = vpop.f32.mrb[22].mxu0 }
 0x835   :  { %v2367_v51 = vadd.f32 %v2359_v54, %v2317_v46  ;;  %v2327_v52 = vadd.f32 %v3546_v56, %v4558_v38  ;;  %v2321_v4 = vpop.f32.mrb[23].mxu0 }
 0x836   :  { %v2366_v6 = vadd.f32 %v2358_v57, %v2312_v48  ;;  %v2322_v32 = vadd.f32 %v2321_v4, %v4558_v38 }
 0x837   :  { %v2375_v24 = vmul.f32 0.7978846, %v2367_v51  ;;  %v2345_v39 = vmul.f32 %v2327_v52, %v2327_v52 }
 0x838   :  { %v2374_v43 = vmul.f32 0.7978846, %v2366_v6  ;;  %v2344_v61 = vmul.f32 %v2322_v32, %v2322_v32 }
 0x839   :  { %3851 = vtanh.f32 %v2375_v24  ;;  %v2353_v29 = vmul.f32 %v2345_v39, %v2327_v52 }
 0x83a   :  { %3853 = vtanh.f32 %v2374_v43  ;;  %v2352_v58 = vmul.f32 %v2344_v61, %v2322_v32  ;;  %v2422_v61 = vsub.s32 3, %v4146_v18 }
 0x83b   :  { %v2361_v41 = vmul.f32 0.044715, %v2353_v29 }
 0x83c   :  { %v2360_v33 = vmul.f32 0.044715, %v2352_v58  ;;  %v2423_v29 = vrot.slane %v4555_v36, %v2422_v61 }
 0x83d   :  { %v2369_v62 = vadd.f32 %v2361_v41, %v2327_v52 }
 0x83e   :  { %v2368_v25 = vadd.f32 %v2360_v33, %v2322_v32 }
 0x83f   :  { %v2377_v10 = vmul.f32 0.7978846, %v2369_v62 }
 0x840   :  { %v2376_v1 = vmul.f32 0.7978846, %v2368_v25 }
 0x841   :  { %3855 = vtanh.f32 %v2377_v10 }
 0x842   :  { %3857 = vtanh.f32 %v2376_v1 }
 0x843   :  { %v3852_v8 = vpop.eup %3851 }
 0x844   :  { %v3854_v5 = vpop.eup %3853  ;;  %v2391_v9 = vadd.f32 1.0, %v3852_v8 }
 0x845   :  { %v2390_v23 = vadd.f32 1.0, %v3854_v5 }
 0x846   :  { %v2399_v21 = vmul.f32 0.5, %v2391_v9 }
 0x847   :  { %v2398_v22 = vmul.f32 0.5, %v2390_v23 }
 0x848   :  { %v2407_v26 = vmul.f32 %v2399_v21, %v2317_v46 }
 0x849   :  { %v2406_v50 = vmul.f32 %v2398_v22, %v2312_v48 }
 0x84b   :  { %v3856_v40 = vpop.eup %3855  ;;  %3569 = vmatprep.mubr.msk.f32.mxu1 %vm2424_vm0, %v2406_v50 }
 0x84c   :  { %v3858_v20 = vpop.eup %3857  ;;  %3570 = vmatmul.mubr.msk.f32.gmra.mrb[40].mxu1 %vm2424_vm0, %v2407_v26  ;;  %v2393_v34 = vadd.f32 1.0, %v3856_v40 }
 0x84d   :  { %v2392_v37 = vadd.f32 1.0, %v3858_v20 }
 0x84e   :  { %v2401_v12 = vmul.f32 0.5, %v2393_v34 }
 0x84f   :  { %v2400_v42 = vmul.f32 0.5, %v2392_v37 }
 0x850   :  { %v3549_v44 = vpop.f32.mrb[24].mxu0  ;;  %v2409_v47 = vmul.f32 %v2401_v12, %v2327_v52 }
 0x851   :  { %v2337_v7 = vadd.f32 %v3549_v44, %v4558_v38  ;;  %v2331_v45 = vpop.f32.mrb[25].mxu0  ;;  %v2408_v14 = vmul.f32 %v2400_v42, %v2322_v32 }
 0x852   :  { %v2332_v15 = vadd.f32 %v2331_v45, %v4558_v38 }
 0x853   :  { %v2347_v48 = vmul.f32 %v2337_v7, %v2337_v7  ;;  %3572 = vmatprep.mubr.msk.f32.mxu1 %vm2424_vm0, %v2408_v14 }
 0x854   :  { %v2346_v46 = vmul.f32 %v2332_v15, %v2332_v15  ;;  %3573 = vmatmul.mubr.msk.f32.gmra.mrb[42].mxu1 %vm2424_vm0, %v2409_v47 }
 0x855   :  { %v2355_v59 = vmul.f32 %v2347_v48, %v2337_v7 }
 0x856   :  { %v2354_v49 = vmul.f32 %v2346_v46, %v2332_v15 }
 0x857   :  { %v2363_v30 = vmul.f32 0.044715, %v2355_v59 }
 0x858   :  { %v2362_v53 = vmul.f32 0.044715, %v2354_v49 }
 0x859   :  { %v2371_v54 = vadd.f32 %v2363_v30, %v2337_v7 }
 0x85a   :  { %v2370_v57 = vadd.f32 %v2362_v53, %v2332_v15 }
 0x85b   :  { %v2379_v56 = vmul.f32 0.7978846, %v2371_v54 }
 0x85c   :  { %v2378_v51 = vmul.f32 0.7978846, %v2370_v57 }
 0x85d   :  { %3859 = vtanh.f32 %v2379_v56 }
 0x85e   :  { %3861 = vtanh.f32 %v2378_v51 }
 0x867   :  { %v3860_v4 = vpop.eup %3859 }
 0x868   :  { %v3862_v6 = vpop.eup %3861  ;;  %v2395_v38 = vadd.f32 1.0, %v3860_v4 }
 0x869   :  { %v2394_v52 = vadd.f32 1.0, %v3862_v6 }
 0x86a   :  { %v2403_v32 = vmul.f32 0.5, %v2395_v38 }
 0x86b   :  { %v2402_v24 = vmul.f32 0.5, %v2394_v52  ;;  %v3777_v52 = vpack.i.bf16 %v4399_v0, %v4394_v63 }
 0x86c   :  { %v2411_v43 = vmul.f32 %v2403_v32, %v2337_v7  ;;  %v3782_v32 = vpack.i.bf16 %v4411_v3, %v4406_v2  ;;  %v2684_v3 = vsub.s32 6, %v4146_v18 }
 0x86d   :  { %v2410_v39 = vmul.f32 %v2402_v24, %v2332_v15  ;;  %v4651_v24 = vld [vmem:[%s4753_s5 + $0x8] sm:$0xf] }
 0x86f   :  { %3575 = vmatprep.mubr.msk.f32.mxu1 %vm2424_vm0, %v2410_v39 }
 0x870   :  { %3576 = vmatmul.mubr.msk.f32.gmra.mrb[44].mxu1 %vm2424_vm0, %v2411_v43 }
 0x8ed   :  { %v3568_v58 = vpop.f32.mrb[38].mxu1 }
 0x8ee   :  { %v2521_v41 = vadd.f32 %v3568_v58, %v2423_v29  ;;  %v2515_v33 = vpop.f32.mrb[39].mxu1  ;;  %v2696_v58 = vsub.s32 7, %v4146_v18 }
 0x8ef   :  { %v2516_v62 = vadd.f32 %v2515_v33, %v2423_v29  ;;  %v4660_v33 = vrot.slane %v4555_v36, %v2684_v3 }
 0x8f0   :  { %v4579_v25 = vadd.f32 %v2521_v41, %v4481_v55 }
 0x8f1   :  { %v4582_v10 = vadd.f32 %v2516_v62, %v4475_v28 }
 0x8f2   :  { %v2565_v1 = vsel %vm323_vm14, %v4579_v25, 0.0  ;;  %v2595_v8 = vmul.f32 %v4579_v25, %v4579_v25 }
 0x8f3   :  { %2566 = vadd.xlane.f32.xlu0 %v2565_v1  ;;  %v2562_v5 = vsel %vm323_vm14, %v4582_v10, 0.0  ;;  %v2594_v9 = vmul.f32 %v4582_v10, %v4582_v10 }
 0x8f4   :  { %2563 = vadd.xlane.f32.xlu1 %v2562_v5  ;;  %v2605_v55 = vsel %vm323_vm14, %v2595_v8, 0.0  ;;  %v4663_v8 = vrot.slane %v4555_v36, %v2696_v58 }
 0x8f5   :  { %v2602_v28 = vsel %vm323_vm14, %v2594_v9, 0.0 }
 0x8f7   :  { %2606 = vadd.xlane.f32.xlu0 %v2605_v55 }
 0x8f8   :  { %2603 = vadd.xlane.f32.xlu1 %v2602_v28 }
 0x91f   :  { %v3571_v23 = vpop.f32.mrb[40].mxu1 }
 0x920   :  { %v2531_v21 = vadd.f32 %v3571_v23, %v2423_v29  ;;  %v2525_v22 = vpop.f32.mrb[41].mxu1 }
 0x921   :  { %v2526_v50 = vadd.f32 %v2525_v22, %v2423_v29 }
 0x922   :  { %v4595_v26 = vadd.f32 %v2531_v21, %v4494_v27 }
 0x923   :  { %v4598_v40 = vadd.f32 %v2526_v50, %v4490_v11 }
 0x924   :  { %v2571_v20 = vsel %vm323_vm14, %v4595_v26, 0.0  ;;  %v2597_v34 = vmul.f32 %v4595_v26, %v4595_v26 }
 0x925   :  { %2572 = vadd.xlane.f32.xlu0 %v2571_v20  ;;  %v2568_v37 = vsel %vm323_vm14, %v4598_v40, 0.0  ;;  %v2596_v12 = vmul.f32 %v4598_v40, %v4598_v40 }
 0x926   :  { %2569 = vadd.xlane.f32.xlu1 %v2568_v37  ;;  %v2611_v11 = vsel %vm323_vm14, %v2597_v34, 0.0 }
 0x927   :  { %v3574_v42 = vpop.f32.mrb[42].mxu1  ;;  %v2608_v45 = vsel %vm323_vm14, %v2596_v12, 0.0 }
 0x928   :  { %v2541_v27 = vadd.f32 %v3574_v42, %v2423_v29  ;;  %v2535_v44 = vpop.f32.mrb[43].mxu1 }
 0x929   :  { %v2536_v7 = vadd.f32 %v2535_v44, %v2423_v29  ;;  %2612 = vadd.xlane.f32.xlu0 %v2611_v11 }
 0x92a   :  { %v4611_v14 = vadd.f32 %v2541_v27, %v4507_v35  ;;  %2609 = vadd.xlane.f32.xlu1 %v2608_v45 }
 0x92b   :  { %v4614_v15 = vadd.f32 %v2536_v7, %v4504_v13 }
 0x92c   :  { %v2577_v47 = vsel %vm323_vm14, %v4611_v14, 0.0  ;;  %v2599_v48 = vmul.f32 %v4611_v14, %v4611_v14 }
 0x92d   :  { %2578 = vadd.xlane.f32.xlu0 %v2577_v47  ;;  %v2574_v46 = vsel %vm323_vm14, %v4614_v15, 0.0  ;;  %v2598_v59 = vmul.f32 %v4614_v15, %v4614_v15 }
 0x92e   :  { %2575 = vadd.xlane.f32.xlu1 %v2574_v46  ;;  %v2617_v35 = vsel %vm323_vm14, %v2599_v48, 0.0 }
 0x92f   :  { %v2614_v13 = vsel %vm323_vm14, %v2598_v59, 0.0 }
 0x931   :  { %2618 = vadd.xlane.f32.xlu0 %v2617_v35 }
 0x932   :  { %2615 = vadd.xlane.f32.xlu1 %v2614_v13 }
 0x943   :  { %v3577_v49 = vpop.f32.mrb[44].mxu1 }
 0x944   :  { %v2551_v30 = vadd.f32 %v3577_v49, %v2423_v29  ;;  %v2545_v53 = vpop.f32.mrb[45].mxu1 }
 0x945   :  { %v2546_v54 = vadd.f32 %v2545_v53, %v2423_v29 }
 0x946   :  { %v4627_v57 = vadd.f32 %v2551_v30, %v4521_v17 }
 0x947   :  { %v4630_v56 = vadd.f32 %v2546_v54, %v4518_v16 }
 0x948   :  { %v2583_v51 = vsel %vm323_vm14, %v4627_v57, 0.0  ;;  %v2601_v4 = vmul.f32 %v4627_v57, %v4627_v57 }
 0x949   :  { %2584 = vadd.xlane.f32.xlu0 %v2583_v51  ;;  %v2580_v6 = vsel %vm323_vm14, %v4630_v56, 0.0  ;;  %v2600_v38 = vmul.f32 %v4630_v56, %v4630_v56 }
 0x94a   :  { %2581 = vadd.xlane.f32.xlu1 %v2580_v6  ;;  %v2623_v17 = vsel %vm323_vm14, %v2601_v4, 0.0 }
 0x94b   :  { %v2620_v16 = vsel %vm323_vm14, %v2600_v38, 0.0 }
 0x94d   :  { %2624 = vadd.xlane.f32.xlu0 %v2623_v17 }
 0x94e   :  { %2621 = vadd.xlane.f32.xlu1 %v2620_v16 }
 0x95f   :  { %3778 = vrot.lane.b32.xlu1 %v3777_v52, %s3920_s1 }
 0x963   :  { %3783 = vrot.lane.b32.xlu0 %v3782_v32, %s3920_s1  ;;  %3788 = vrot.lane.b32.xlu1 %v3777_v52, %s3921_s28 }
 0x967   :  { %3018 = vperm.xlu0 %3797, %v4651_v24   ;;  %3793 = vrot.lane.b32.xlu1 %v3782_v32, %s3921_s28 }
 0x980   :  { %v2567_v55 = vpop.xlane.xlu0 %2566 }
 0x981   :  { %v2564_v39 = vpop.xlane.xlu1 %2563  ;;  %v2587_v20 = vmul.f32 0.03125, %v2567_v55 }
 0x982   :  { %v2586_v63 = vmul.f32 0.03125, %v2564_v39 }
 0x983   :  { %v2635_v42 = vmul.f32 %v2587_v20, %v2587_v20 }
 0x984   :  { %v2634_v43 = vmul.f32 %v2586_v63, %v2586_v63  ;;  %v2650_v41 = vsub.f32 %v4582_v10, %v2586_v63  ;;  %v2607_v28 = vpop.xlane.xlu0 %2606 }
 0x985   :  { %v2604_v0 = vpop.xlane.xlu1 %2603  ;;  %v2627_v12 = vmul.f32 0.03125, %v2607_v28 }
 0x986   :  { %v2626_v61 = vmul.f32 0.03125, %v2604_v0 }
 0x987   :  { %v2643_v45 = vsub.f32 %v2627_v12, %v2635_v42 }
 0x988   :  { %v2642_v29 = vsub.f32 %v2626_v61, %v2634_v43 }
 0x989   :  { %v2659_v30 = vadd.f32 1e-12, %v2643_v45 }
 0x98a   :  { %v2658_v2 = vadd.f32 1e-12, %v2642_v29 }
 0x98c   :  { %3863 = vrsqrt.f32 %v2658_v2 }
 0x98d   :  { %3865 = vrsqrt.f32 %v2659_v30 }
 0x996   :  { %v3864_v62 = vpop.eup %3863 }
 0x997   :  { %v2674_v1 = vmul.f32 %v3864_v62, %v2650_v41 }
 0x999   :  { %v2686_v5 = vmul.f32 %v4660_v33, %v2674_v1 }
 0x99b   :  { %v2698_v9 = vadd.f32 %v4663_v8, %v2686_v5  ;;  %v3866_v5 = vpop.eup %3865 }
 0x99d   :  { %3586 = vmatprep.mubr.msk.f32.mxu0 %vm323_vm14, %v2698_v9 }
 0x9b2   :  { %v2573_v21 = vpop.xlane.xlu0 %2572 }
 0x9b3   :  { %v2570_v23 = vpop.xlane.xlu1 %2569  ;;  %v4670_v27 = vmul.f32 0.03125, %v2573_v21 }
 0x9b4   :  { %v4668_v34 = vmul.f32 0.03125, %v2570_v23 }
 0x9b5   :  { %v2637_v35 = vmul.f32 %v4670_v27, %v4670_v27 }
 0x9b6   :  { %v2613_v10 = vpop.xlane.xlu0 %2612  ;;  %v2636_v11 = vmul.f32 %v4668_v34, %v4668_v34  ;;  %v2652_v12 = vsub.f32 %v4598_v40, %v4668_v34 }
 0x9b7   :  { %v2610_v22 = vpop.xlane.xlu1 %2609  ;;  %v2629_v47 = vmul.f32 0.03125, %v2613_v10 }
 0x9b8   :  { %v2628_v36 = vmul.f32 0.03125, %v2610_v22  ;;  %v2651_v22 = vsub.f32 %v4579_v25, %v2587_v20 }
 0x9b9   :  { %v2645_v53 = vsub.f32 %v2629_v47, %v2637_v35 }
 0x9ba   :  { %v2579_v37 = vpop.xlane.xlu0 %2578  ;;  %v2644_v48 = vsub.f32 %v2628_v36, %v2636_v11  ;;  %v2675_v36 = vmul.f32 %v3866_v5, %v2651_v22 }
 0x9bb   :  { %v2576_v50 = vpop.xlane.xlu1 %2575  ;;  %v4678_v13 = vmul.f32 0.03125, %v2579_v37  ;;  %v2661_v38 = vadd.f32 1e-12, %v2645_v53 }
 0x9bc   :  { %v4674_v7 = vmul.f32 0.03125, %v2576_v50  ;;  %v2660_v51 = vadd.f32 1e-12, %v2644_v48  ;;  %v2653_v48 = vsub.f32 %v4595_v26, %v4670_v27  ;;  %v2687_v20 = vmul.f32 %v4660_v33, %v2675_v36 }
 0x9bd   :  { %v2639_v6 = vmul.f32 %v4678_v13, %v4678_v13  ;;  %v2655_v35 = vsub.f32 %v4611_v14, %v4678_v13 }
 0x9be   :  { %v2619_v46 = vpop.xlane.xlu0 %2618  ;;  %v2638_v49 = vmul.f32 %v4674_v7, %v4674_v7  ;;  %3867 = vrsqrt.f32 %v2660_v51  ;;  %v2654_v25 = vsub.f32 %v4614_v15, %v4674_v7 }
 0x9bf   :  { %v2616_v44 = vpop.xlane.xlu1 %2615  ;;  %v2631_v54 = vmul.f32 0.03125, %v2619_v46  ;;  %3869 = vrsqrt.f32 %v2661_v38 }
 0x9c0   :  { %v2630_v59 = vmul.f32 0.03125, %v2616_v44 }
 0x9c1   :  { %v2647_v17 = vsub.f32 %v2631_v54, %v2639_v6 }
 0x9c2   :  { %v2646_v4 = vsub.f32 %v2630_v59, %v2638_v49  ;;  %v2699_v49 = vadd.f32 %v4663_v8, %v2687_v20 }
 0x9c3   :  { %v2663_v0 = vadd.f32 1e-12, %v2647_v17 }
 0x9c4   :  { %v2662_v16 = vadd.f32 1e-12, %v2646_v4 }
 0x9c6   :  { %3871 = vrsqrt.f32 %v2662_v16 }
 0x9c7   :  { %3873 = vrsqrt.f32 %v2663_v0 }
 0x9c8   :  { %v3868_v21 = vpop.eup %3867 }
 0x9c9   :  { %v3870_v11 = vpop.eup %3869  ;;  %v2676_v45 = vmul.f32 %v3868_v21, %v2652_v12 }
 0x9ca   :  { %v2677_v40 = vmul.f32 %v3870_v11, %v2653_v48  ;;  %v2866_v48 = vrot.slane %v4651_v24, %v1907_v60 }
 0x9cb   :  { %v2688_v46 = vmul.f32 %v4660_v33, %v2676_v45 }
 0x9cc   :  { %v2689_v26 = vmul.f32 %v4660_v33, %v2677_v40 }
 0x9cd   :  { %v2700_v7 = vadd.f32 %v4663_v8, %v2688_v46 }
 0x9ce   :  { %v2701_v13 = vadd.f32 %v4663_v8, %v2689_v26 }
 0x9d0   :  { %v3872_v47 = vpop.eup %3871 }
 0x9d1   :  { %v3874_v34 = vpop.eup %3873  ;;  %v2678_v59 = vmul.f32 %v3872_v47, %v2654_v25  ;;  %v3922_v47 = vmov 0.0|0.0  }
 0x9d2   :  { %v2679_v27 = vmul.f32 %v3874_v34, %v2655_v35 }
 0x9d3   :  { %v2690_v53 = vmul.f32 %v4660_v33, %v2678_v59 }
 0x9d4   :  { %v2691_v4 = vmul.f32 %v4660_v33, %v2679_v27 }
 0x9d5   :  { %v2702_v38 = vadd.f32 %v4663_v8, %v2690_v53 }
 0x9d6   :  { %v2585_v52 = vpop.xlane.xlu0 %2584 }
 0x9d7   :  { %v2593_v32 = vmul.f32 0.03125, %v2585_v52  ;;  %v2582_v39 = vpop.xlane.xlu1 %2581 }
 0x9d8   :  { %v2592_v63 = vmul.f32 0.03125, %v2582_v39 }
 0x9d9   :  { %v2641_v61 = vmul.f32 %v2593_v32, %v2593_v32  ;;  %v2657_v51 = vsub.f32 %v4627_v57, %v2593_v32  ;;  %v2703_v57 = vadd.f32 %v4663_v8, %v2691_v4 }
 0x9da   :  { %v2625_v43 = vpop.xlane.xlu0 %2624  ;;  %v2640_v3 = vmul.f32 %v2592_v63, %v2592_v63  ;;  %v2656_v15 = vsub.f32 %v4630_v56, %v2592_v63 }
 0x9db   :  { %v2633_v29 = vmul.f32 0.03125, %v2625_v43  ;;  %v2622_v2 = vpop.xlane.xlu1 %2621 }
 0x9dc   :  { %v2632_v58 = vmul.f32 0.03125, %v2622_v2 }
 0x9dd   :  { %v2649_v41 = vsub.f32 %v2633_v29, %v2641_v61 }
 0x9de   :  { %v2648_v62 = vsub.f32 %v2632_v58, %v2640_v3  ;;  %v3784_v1 = vpop.permute.xlu0 %3783 }
 0x9df   :  { %v2665_v9 = vadd.f32 1e-12, %v2649_v41  ;;  %v3779_v55 = vpop.permute.xlu1 %3778  ;;  %v3786_v28 = vunpack.i.h.bf16 %v3784_v1  ;;  %v3785_v23 = vunpack.i.l.bf16 %v3784_v1 }
 0x9e0   :  { %v2664_v10 = vadd.f32 1e-12, %v2648_v62  ;;  %v3781_v50 = vunpack.i.h.bf16 %v3779_v55  ;;  %v3780_v37 = vunpack.i.l.bf16 %v3779_v55 }
 0x9e1   :  { %3875 = vrsqrt.f32 %v2665_v9  ;;  %v3711_v44 = vpack.c.bf16 %v3786_v28, %v3785_v23 }
 0x9e2   :  { %3877 = vrsqrt.f32 %v2664_v10  ;;  %v3707_v42 = vpack.c.bf16 %v3781_v50, %v3780_v37 }
 0x9e3   :  { %v3789_v32 = vpop.permute.xlu1 %3788 }
 0x9e4   :  { %3708 = vmatprep.subr.bf16.mxu0 %v3707_v42  ;;  %v3791_v39 = vunpack.i.h.bf16 %v3789_v32  ;;  %v3790_v63 = vunpack.i.l.bf16 %v3789_v32 }
 0x9e5   :  { %3710 = vmatpush3.bf16.msra.mxu0 %v3707_v42 }
 0x9e6   :  { %3712 = vmatprep.subr.bf16.mxu0 %v3711_v44  ;;  %v3715_v0 = vpack.c.bf16 %v3791_v39, %v3790_v63  ;;  %v3020_v39 = vrot.slane %v4651_v24, 3  ;;  %v3019_v63 = vpop.permute.xlu0 %3018 }
 0x9e7   :  { %v3794_v43 = vpop.permute.xlu1 %3793 }
 0x9e8   :  { %v3796_v61 = vunpack.i.h.bf16 %v3794_v43  ;;  %3716 = vmatprep.subr.bf16.mxu1 %v3715_v0 }
 0x9e9   :  { %3714 = vmatpush3.bf16.msra.mxu0 %v3711_v44  ;;  %3718 = vmatpush3.bf16.msra.mxu1 %v3715_v0  ;;  %v3021_v0 = vrot.slane %v3019_v63, 2 }
 0x9ea   :  { %3723 = vmatprep.subr.bf16.mxu0 %v3922_v47 }
 0x9eb   :  { %v3876_v30 = vpop.eup %3875 }
 0x9ec   :  { %v3878_v54 = vpop.eup %3877  ;;  %3587 = vmatmul.mubr.msk.f32.vlgmr.msra.gmra.mrb[26].mxu0 %vm323_vm14, %v2699_v49  ;;  %v2681_v6 = vmul.f32 %v3876_v30, %v2657_v51 }
 0x9ed   :  { %3589 = vmatprep.mubr.msk.f32.mxu0 %vm323_vm14, %v2700_v7  ;;  %v2680_v14 = vmul.f32 %v3878_v54, %v2656_v15 }
 0x9ee   :  { %v2693_v17 = vmul.f32 %v4660_v33, %v2681_v6 }
 0x9ef   :  { %v2692_v56 = vmul.f32 %v4660_v33, %v2680_v14  ;;  %v3795_v33 = vunpack.i.l.bf16 %v3794_v43 }
 0x9f0   :  { %3590 = vmatmul.mubr.msk.f32.gmra.mrb[28].mxu0 %vm323_vm14, %v2701_v13  ;;  %v2705_v52 = vadd.f32 %v4663_v8, %v2693_v17 }
 0x9f1   :  { %3592 = vmatprep.mubr.msk.f32.mxu0 %vm323_vm14, %v2702_v38  ;;  %v2704_v16 = vadd.f32 %v4663_v8, %v2692_v56  ;;  %v3719_v29 = vpack.c.bf16 %v3796_v61, %v3795_v33  ;;  %v2709_v8 = vrot.slane %v4651_v24, %v4153_v19 }
 0x9f3   :  { %3720 = vmatprep.subr.bf16.mxu1 %v3719_v29 }
 0x9f4   :  { %3593 = vmatmul.mubr.msk.f32.gmra.mrb[30].mxu0 %vm323_vm14, %v2703_v57  ;;  %3722 = vmatpush3.bf16.msra.mxu1 %v3719_v29 }
 0x9f5   :  { %3595 = vmatprep.mubr.msk.f32.mxu0 %vm323_vm14, %v2704_v16 }
 0x9f8   :  { %3596 = vmatmul.mubr.msk.f32.gmra.mrb[32].mxu0 %vm323_vm14, %v2705_v52 }
 0x9f9   :  { %3634 = vmatprep.mubr.msk.f32.mxu0 %vm3917_vm7, %v3916_v31 }
 0xabf   :  { %v3588_v2 = vpop.f32.mrb[26].mxu0 }
 0xac0   :  { %v2822_v3 = vadd.f32 %v3588_v2, %v2709_v8  ;;  %v2816_v58 = vpop.f32.mrb[27].mxu0 }
 0xac1   :  { %v2817_v41 = vadd.f32 %v2816_v58, %v2709_v8 }
 0xac3   :  { %3879 = vtanh.f32 %v2817_v41  ;;  %v3591_v31 = vpop.f32.mrb[28].mxu0 }
 0xac4   :  { %3881 = vtanh.f32 %v2822_v3  ;;  %v2832_v62 = vadd.f32 %v3591_v31, %v2709_v8  ;;  %v2826_v1 = vpop.f32.mrb[29].mxu0 }
 0xac5   :  { %v2827_v5 = vadd.f32 %v2826_v1, %v2709_v8 }
 0xac7   :  { %3883 = vtanh.f32 %v2827_v5  ;;  %v3594_v9 = vpop.f32.mrb[30].mxu0 }
 0xac8   :  { %3885 = vtanh.f32 %v2832_v62  ;;  %v2842_v55 = vadd.f32 %v3594_v9, %v2709_v8  ;;  %v2836_v28 = vpop.f32.mrb[31].mxu0 }
 0xac9   :  { %v2837_v23 = vadd.f32 %v2836_v28, %v2709_v8 }
 0xacb   :  { %3887 = vtanh.f32 %v2837_v23  ;;  %v3597_v21 = vpop.f32.mrb[32].mxu0 }
 0xacc   :  { %3889 = vtanh.f32 %v2842_v55  ;;  %v2852_v19 = vadd.f32 %v3597_v21, %v2709_v8  ;;  %v2846_v22 = vpop.f32.mrb[33].mxu0 }
 0xacd   :  { %v3880_v10 = vpop.eup %3879  ;;  %v2847_v50 = vadd.f32 %v2846_v22, %v2709_v8 }
 0xace   :  { %v3882_v37 = vpop.eup %3881  ;;  %3606 = vmatprep.mubr.msk.f32.mxu1 %vm323_vm14, %v3880_v10 }
 0xacf   :  { %3891 = vtanh.f32 %v2847_v50  ;;  %3607 = vmatmul.mubr.msk.f32.vlgmr.msra.gmra.mrb[46].mxu1 %vm323_vm14, %v3882_v37 }
 0xad0   :  { %3893 = vtanh.f32 %v2852_v19 }
 0xad1   :  { %v3884_v12 = vpop.eup %3883 }
 0xad2   :  { %v3886_v36 = vpop.eup %3885  ;;  %3609 = vmatprep.mubr.msk.f32.mxu1 %vm323_vm14, %v3884_v12 }
 0xad3   :  { %3610 = vmatmul.mubr.msk.f32.gmra.mrb[48].mxu1 %vm323_vm14, %v3886_v36 }
 0xad5   :  { %v3888_v42 = vpop.eup %3887 }
 0xad6   :  { %v3890_v44 = vpop.eup %3889  ;;  %3612 = vmatprep.mubr.msk.f32.mxu1 %vm323_vm14, %v3888_v42 }
 0xad7   :  { %3613 = vmatmul.mubr.msk.f32.gmra.mrb[50].mxu1 %vm323_vm14, %v3890_v44 }
 0xad9   :  { %v3892_v11 = vpop.eup %3891 }
 0xada   :  { %v3894_v45 = vpop.eup %3893  ;;  %3615 = vmatprep.mubr.msk.f32.mxu1 %vm323_vm14, %v3892_v11 }
 0xadb   :  { %3616 = vmatmul.mubr.msk.f32.gmra.mrb[52].mxu1 %vm323_vm14, %v3894_v45 }
 0xba2   :  { %v3608_v25 = vpop.f32.mrb[46].mxu1 }
 0xba3   :  { %v2975_v20 = vadd.f32 %v3608_v25, %v2866_v48  ;;  %v2969_v40 = vpop.f32.mrb[47].mxu1 }
 0xba4   :  { %v2970_v34 = vadd.f32 %v2969_v40, %v2866_v48 }
 0xba5   :  { %3895 = vtanh.f32 %v2975_v20 }
 0xba6   :  { %3897 = vtanh.f32 %v2970_v34  ;;  %v3611_v46 = vpop.f32.mrb[48].mxu1 }
 0xba7   :  { %v2985_v59 = vadd.f32 %v3611_v46, %v2866_v48  ;;  %v2979_v35 = vpop.f32.mrb[49].mxu1 }
 0xba8   :  { %v2980_v49 = vadd.f32 %v2979_v35, %v2866_v48 }
 0xba9   :  { %3899 = vtanh.f32 %v2985_v59 }
 0xbaa   :  { %3901 = vtanh.f32 %v2980_v49  ;;  %v3614_v26 = vpop.f32.mrb[50].mxu1 }
 0xbab   :  { %v2995_v27 = vadd.f32 %v3614_v26, %v2866_v48  ;;  %v2989_v30 = vpop.f32.mrb[51].mxu1 }
 0xbac   :  { %v2990_v15 = vadd.f32 %v2989_v30, %v2866_v48 }
 0xbad   :  { %3903 = vtanh.f32 %v2995_v27 }
 0xbae   :  { %3905 = vtanh.f32 %v2990_v15  ;;  %v3617_v18 = vpop.f32.mrb[52].mxu1 }
 0xbaf   :  { %v3896_v60 = vpop.eup %3895  ;;  %v3005_v7 = vadd.f32 %v3617_v18, %v2866_v48  ;;  %v2999_v53 = vpop.f32.mrb[53].mxu1 }
 0xbb0   :  { %v3898_v54 = vpop.eup %3897  ;;  %v3000_v51 = vadd.f32 %v2999_v53, %v2866_v48 }
 0xbb1   :  { %3907 = vtanh.f32 %v3005_v7  ;;  %v3724_v13 = vpack.c.bf16 %v3896_v60, %v3898_v54 }
 0xbb2   :  { %3909 = vtanh.f32 %v3000_v51 }
 0xbb3   :  { %v3900_v4 = vpop.eup %3899  ;;  %3726 = vmatpush3.bf16.xpose.msk.msra.mxu0 %vm4733_vm1, %v3724_v13 }
 0xbb4   :  { %v3902_v6 = vpop.eup %3901  ;;  %3727 = vmatprep.subr.bf16.mxu0 %v3922_v47 }
 0xbb5   :  { %v3728_v38 = vpack.c.bf16 %v3900_v4, %v3902_v6 }
 0xbb7   :  { %v3904_v56 = vpop.eup %3903 }
 0xbb8   :  { %v3906_v57 = vpop.eup %3905 }
 0xbb9   :  { %v3732_v17 = vpack.c.bf16 %v3904_v56, %v3906_v57 }
 0xbbb   :  { %v3908_v16 = vpop.eup %3907  ;;  %3730 = vmatpush3.bf16.xpose.msk.msra.mxu0 %vm4733_vm1, %v3728_v38 }
 0xbbc   :  { %v3910_v52 = vpop.eup %3909  ;;  %3731 = vmatprep.subr.bf16.mxu0 %v3922_v47 }
 0xbbd   :  { %v3736_v32 = vpack.c.bf16 %v3908_v16, %v3910_v52 }
 0xbc3   :  { %3734 = vmatpush3.bf16.xpose.msk.msra.mxu0 %vm4733_vm1, %v3732_v17 }
 0xbc4   :  { %3735 = vmatprep.subr.bf16.mxu0 %v3922_v47 }
 0xbcb   :  { %3738 = vmatpush3.bf16.xpose.msk.msra.mxu0 %vm4733_vm1, %v3736_v32 }
 0xbd2   :  { %3635 = vmatmul.mubr.msk.f32.vlgmr.msra.gmra.mrb[34].mxu0 %vm323_vm14, %v3020_v39 }
 0xca5   :  { %v3115_v43 = vpop.f32.mrb[34].mxu0 }
 0xca6   :  { %v3116_v61 = vadd.f32 %v3115_v43, %v3021_v0  ;;  %v3636_v33 = vpop.f32.mrb[35].mxu0 }
 0xca8   :  { %3120 = vst.msk [vmem:[%s4756_s6] sm:$0x1] %vm3119_vm2, %v3116_v61 }

</bundles_post_ra>
